<compile_context>
chip_gen: v7x
topology: tpu7x:2x2x1
jax: 0.10.0
libtpu: 0.0.40
codegen_flags: <defaults>
</compile_context>

<pallas_src>
import functools

import jax
import jax.numpy as jnp
from jax.experimental import pallas as pl
from jax.experimental.pallas import tpu as pltpu

BN_EPS = 1e-5


def _pick_vmem_limit():
    """~3/4 of the chip's physical VMEM (v5e/v6e 128 MiB -> 96, v7x 64 -> 48)."""
    cap = 64 * 1024 * 1024
    try:
        cap = int(pltpu.get_tpu_info().vmem_capacity_bytes)
    except Exception:
        pass
    return max(32 * 1024 * 1024, (cap * 3) // 4)


def _double_cov_kernel(x_ref, masks_ref, w1_ref, g1_ref, bt1_ref,
                       w2_ref, g2_ref, bt2_ref,
                       o_ref,
                       y1_ref, y2_ref, patches_ref,
                       s1_ref, ss1_ref, s2_ref, ss2_ref,
                       *, H, W, N):
    phase = pl.program_id(0)
    tile = pl.program_id(1)
    Nb = x_ref.shape[0]
    HW = H * W
    L = Nb * HW                                  # lane extent per grid step
    inv_cnt = 1.0 / float(N * HW)                # BN reduces over (N, H, W)

    def conv3x3(act, w_ref):
        """act: (C, L) f32, per-sample-contiguous lanes -> (Cout, L) f32."""
        C = act.shape[0]
        masks = masks_ref[...]                   # (8, L) precomputed borders
        m = 0
        for ky in range(3):
            for kx in range(3):
                dy, dx = ky - 1, kx - 1
                rows = pl.ds((ky * 3 + kx) * C, C)
                if dy == 0 and dx == 0:
                    patches_ref[rows, :] = act.astype(patches_ref.dtype)
                    continue
                d = dy * W + dx
                # shifted[c, q] == act[c, q + d]; any wrap across the image
                # or sample boundary lands only on positions the mask zeroes.
                shifted = pltpu.roll(act, (-d) % L, 1)
                patches_ref[rows, :] = (
                    shifted * masks[m:m + 1, :]).astype(patches_ref.dtype)
                m += 1
        return jnp.dot(w_ref[...], patches_ref[pl.ds(0, 9 * C), :],
                       preferred_element_type=jnp.float32)

    def accum_stats(y, s_ref, ss_ref):
        # Per-channel sum / sum-of-squares on the MXU (frees the XLU slot).
        ones_col = jnp.ones((L, 1), jnp.float32)
        s_ref[...] += jnp.dot(y, ones_col, preferred_element_type=jnp.float32)
        ss_ref[...] += jnp.dot(y * y, ones_col,
                               preferred_element_type=jnp.float32)

    def bn_scale_shift(s_ref, ss_ref, g_ref, bt_ref):
        mean = s_ref[...] * inv_cnt
        var = jnp.maximum(ss_ref[...] * inv_cnt - mean * mean, 0.0)  # clamp
        scale = g_ref[...] * jax.lax.rsqrt(var + BN_EPS)
        shift = bt_ref[...] - mean * scale
        return scale, shift

    @pl.when((phase == 0) & (tile == 0))
    def _init_stats():
        for r in (s1_ref, ss1_ref, s2_ref, ss2_ref):
            r[...] = jnp.zeros_like(r)

    @pl.when(phase == 0)                         # conv1 + BN1 statistics
    def _pass1():
        # (Nb, C, HW) tile -> (C, Nb*HW): lane-aligned per-sample concat.
        act = jnp.concatenate(
            [x_ref[n].astype(jnp.float32) for n in range(Nb)], axis=1)
        y1 = conv3x3(act, w1_ref)                # (Cout, L) f32
        y1_ref[tile] = y1.astype(y1_ref.dtype)
        accum_stats(y1, s1_ref, ss1_ref)

    @pl.when(phase == 1)                         # BN1 + ReLU + conv2 + BN2 stats
    def _pass2():
        scale1, shift1 = bn_scale_shift(s1_ref, ss1_ref, g1_ref, bt1_ref)
        h = jnp.maximum(y1_ref[tile].astype(jnp.float32) * scale1 + shift1, 0.0)
        y2 = conv3x3(h, w2_ref)
        y2_ref[tile] = y2.astype(y2_ref.dtype)
        accum_stats(y2, s2_ref, ss2_ref)

    @pl.when(phase == 2)                         # BN2 + ReLU + lane-dense store
    def _pass3():
        scale2, shift2 = bn_scale_shift(s2_ref, ss2_ref, g2_ref, bt2_ref)
        out = jnp.maximum(y2_ref[tile].astype(jnp.float32) * scale2 + shift2,
                          0.0)
        for n in range(Nb):                      # full-width unmasked stores
            o_ref[n] = out[:, n * HW:(n + 1) * HW].astype(o_ref.dtype)


def double_cov_forward(x_nchw, params):
    """params = (w1, b1, g1, bt1, w2, b2, g2, bt2); conv weights in OIHW.

    Conv biases are dropped inside the kernel: training-mode BatchNorm
    subtracts the per-channel batch mean right after each conv, which cancels
    a per-channel bias exactly.
    """
    w1, _b1, g1, bt1, w2, _b2, g2, bt2 = params
    N, Cin, H, W = x_nchw.shape
    Cout = w1.shape[0]
    HW = H * W

    # bf16 MXU operands (f32 accumulation) once channels are MXU-relevant;
    # f32 at small channel counts to keep the small-shape tolerance tight.
    use_bf16 = min(Cin, Cout) >= 16
    mxu_dtype = jnp.bfloat16 if use_bf16 else jnp.float32
    sub = 16 if use_bf16 else 8                  # sublane packing granule

    cin_p = -(-Cin // sub) * sub
    cout_p = -(-Cout // sub) * sub

    # Batch tile: widest lane extent (Nb*HW) that divides N, capped ~4096.
    nb = 1
    for cand in range(1, N + 1):
        if N % cand == 0 and cand * HW <= 4096:
            nb = cand
    num_tiles = N // nb
    L = nb * HW

    # NCHW kept end-to-end: free metadata reshape + channel zero-pad only.
    x3 = x_nchw.reshape(N, Cin, HW)
    if cin_p != Cin:
        x3 = jnp.pad(x3, ((0, 0), (0, cin_p - Cin), (0, 0)))
        w1 = jnp.pad(w1, ((0, 0), (0, cin_p - Cin), (0, 0), (0, 0)))
    if cout_p != Cout:
        w1 = jnp.pad(w1, ((0, cout_p - Cout), (0, 0), (0, 0), (0, 0)))
        w2 = jnp.pad(w2, ((0, cout_p - Cout), (0, cout_p - Cout),
                          (0, 0), (0, 0)))
        g1 = jnp.pad(g1, (0, cout_p - Cout))
        bt1 = jnp.pad(bt1, (0, cout_p - Cout))
        g2 = jnp.pad(g2, (0, cout_p - Cout))
        bt2 = jnp.pad(bt2, (0, cout_p - Cout))

    # OIHW -> (Cout, 9*C): rows tap-major (ky*3+kx), channel-minor, matching
    # the kernel's im2col slab.  One-time weight prep, pre-cast to MXU dtype.
    w1m = jnp.transpose(w1, (0, 2, 3, 1)).reshape(cout_p, 9 * cin_p)
    w2m = jnp.transpose(w2, (0, 2, 3, 1)).reshape(cout_p, 9 * cout_p)
    w1m, w2m = w1m.astype(mxu_dtype), w2m.astype(mxu_dtype)
    col = lambda v: v.reshape(cout_p, 1).astype(jnp.float32)

    # Precompute the 8 border-tap masks once: (8, nb*HW) f32, tiled per sample
    # so one roll over the merged lane axis serves every sample in the tile.
    pos = jnp.arange(HW, dtype=jnp.int32)
    py, px = pos // W, pos % W
    rows = []
    for ky in range(3):
        for kx in range(3):
            dy, dx = ky - 1, kx - 1
            if dy == 0 and dx == 0:
                continue
            valid = ((py + dy >= 0) & (py + dy < H) &
                     (px + dx >= 0) & (px + dx < W))
            rows.append(jnp.tile(valid.astype(jnp.float32), nb))
    masks = jnp.stack(rows, axis=0)

    # Full-batch conv1/conv2 stash; drop to bf16 once large (v7x: 64 MiB VMEM).
    # TODO(synk): for very large N*HW, stage these through HBM (or recompute
    # conv1 in phase 1) instead of keeping them VMEM-resident for the batch.
    stash_bytes = 2 * num_tiles * cout_p * L * 4
    stash_dtype = jnp.bfloat16 if stash_bytes > (16 << 20) else jnp.float32

    last_tile = num_tiles - 1
    # Phase-aware index maps: x is fetched only while phase 0 sweeps it, the
    # output block only advances (and writes back) during phase 2.
    x_idx = lambda ph, t: (jnp.where(ph == 0, t, last_tile), 0, 0)
    o_idx = lambda ph, t: (jnp.where(ph == 2, t, 0), 0, 0)
    fixed = lambda r, c: pl.BlockSpec((r, c), lambda ph, t: (0, 0))

    kernel = functools.partial(_double_cov_kernel, H=H, W=W, N=N)

    out3 = pl.pallas_call(
        kernel,
        out_shape=jax.ShapeDtypeStruct((N, cout_p, HW), x_nchw.dtype),
        grid=(3, num_tiles),                     # (phase, batch-tile)
        in_specs=[
            pl.BlockSpec((nb, cin_p, HW), x_idx),         # x
            fixed(8, L),                                   # border masks
            fixed(cout_p, 9 * cin_p),                      # w1 (im2col rows)
            fixed(cout_p, 1), fixed(cout_p, 1),            # g1, bt1
            fixed(cout_p, 9 * cout_p),                     # w2 (im2col rows)
            fixed(cout_p, 1), fixed(cout_p, 1),            # g2, bt2
        ],
        out_specs=pl.BlockSpec((nb, cout_p, HW), o_idx),
        scratch_shapes=[
            pltpu.VMEM((num_tiles, cout_p, L), stash_dtype),     # conv1 raw
            pltpu.VMEM((num_tiles, cout_p, L), stash_dtype),     # conv2 raw
            pltpu.VMEM((9 * max(cin_p, cout_p), L), mxu_dtype),  # im2col slab
            pltpu.VMEM((cout_p, 1), jnp.float32),          # BN1 sum
            pltpu.VMEM((cout_p, 1), jnp.float32),          # BN1 sum of squares
            pltpu.VMEM((cout_p, 1), jnp.float32),          # BN2 sum
            pltpu.VMEM((cout_p, 1), jnp.float32),          # BN2 sum of squares
        ],
        compiler_params=pltpu.CompilerParams(
            # BN batch statistics impose a sequential dependence across both
            # grid axes.  TODO(synk): on v7x, split Cout across the two
            # TensorCores (per-channel stats need no cross-core reduction).
            dimension_semantics=("arbitrary", "arbitrary"),
            vmem_limit_bytes=_pick_vmem_limit(),
        ),
    )(x3, masks, w1m, col(g1), col(bt1), w2m, col(g2), col(bt2))

    if cout_p != Cout:
        out3 = out3[:, :Cout, :]
    return out3.reshape(N, Cout, H, W)           # free metadata-only reshape


def make_params(key, c_in, c_out):
    """PyTorch-style init: conv weights OIHW, BatchNorm2d weight=1, bias=0."""
    k1, k2, k3, k4 = jax.random.split(key, 4)
    bound1 = 1.0 / jnp.sqrt(c_in * 9.0)
    bound2 = 1.0 / jnp.sqrt(c_out * 9.0)
    w1 = jax.random.uniform(k1, (c_out, c_in, 3, 3), jnp.float32, -bound1, bound1)
    b1 = jax.random.uniform(k2, (c_out,), jnp.float32, -bound1, bound1)
    w2 = jax.random.uniform(k3, (c_out, c_out, 3, 3), jnp.float32, -bound2, bound2)
    b2 = jax.random.uniform(k4, (c_out,), jnp.float32, -bound2, bound2)
    g1 = jnp.ones((c_out,), jnp.float32)
    bt1 = jnp.zeros((c_out,), jnp.float32)
    g2 = jnp.ones((c_out,), jnp.float32)
    bt2 = jnp.zeros((c_out,), jnp.float32)
    return (w1, b1, g1, bt1, w2, b2, g2, bt2)


def reference(x_nchw, params):
    w1, b1, g1, bt1, w2, b2, g2, bt2 = params
    x = jnp.transpose(x_nchw, (0, 2, 3, 1))

    def conv(y, w_oihw, b):
        w = jnp.transpose(w_oihw, (2, 3, 1, 0))   # OIHW -> HWIO
        out = jax.lax.conv_general_dilated(
            y, w, window_strides=(1, 1), padding="SAME",
            dimension_numbers=("NHWC", "HWIO", "NHWC"))
        return out + b

    def bn_relu(y, g, bt):
        mean = jnp.mean(y, axis=(0, 1, 2), keepdims=True)
        var = jnp.mean((y - mean) ** 2, axis=(0, 1, 2), keepdims=True)
        return jnp.maximum((y - mean) * jax.lax.rsqrt(var + BN_EPS) * g + bt, 0.0)

    y = bn_relu(conv(x, w1, b1), g1, bt1)
    y = bn_relu(conv(y, w2, b2), g2, bt2)
    return jnp.transpose(y, (0, 3, 1, 2))


if __name__ == "__main__":
    key = jax.random.PRNGKey(0)
    kx, kp = jax.random.split(key)

    N, C_IN, C_OUT, H, W = 2, 4, 8, 16, 16
    x = jax.random.normal(kx, (N, C_IN, H, W), jnp.float32)   # NCHW like PyTorch
    params = make_params(kp, C_IN, C_OUT)

    out = jax.jit(double_cov_forward)(x, params)
    out = jax.block_until_ready(out)

    ref = reference(x, params)
    assert out.shape == (N, C_OUT, H, W), out.shape
    assert jnp.allclose(out, ref, atol=2e-3, rtol=2e-3), \
        float(jnp.max(jnp.abs(out - ref)))

    print("KERNEL_OK")
</pallas_src>

<mosaic_0001>
module attributes {stable_mosaic.version = 11 : i64} {
  func.func @_double_cov_kernel(%arg0: i32, %arg1: i32, %arg2: memref<2x8x256xf32, #tpu.memory_space<vmem>>, %arg3: memref<8x512xf32, #tpu.memory_space<vmem>>, %arg4: memref<8x72xf32, #tpu.memory_space<vmem>>, %arg5: memref<8x1xf32, #tpu.memory_space<vmem>>, %arg6: memref<8x1xf32, #tpu.memory_space<vmem>>, %arg7: memref<8x72xf32, #tpu.memory_space<vmem>>, %arg8: memref<8x1xf32, #tpu.memory_space<vmem>>, %arg9: memref<8x1xf32, #tpu.memory_space<vmem>>, %arg10: memref<2x8x256xf32, #tpu.memory_space<vmem>>, %arg11: memref<1x8x512xf32, #tpu.memory_space<vmem>>, %arg12: memref<1x8x512xf32, #tpu.memory_space<vmem>>, %arg13: memref<72x512xf32, #tpu.memory_space<vmem>>, %arg14: memref<8x1xf32, #tpu.memory_space<vmem>>, %arg15: memref<8x1xf32, #tpu.memory_space<vmem>>, %arg16: memref<8x1xf32, #tpu.memory_space<vmem>>, %arg17: memref<8x1xf32, #tpu.memory_space<vmem>>) attributes {dimension_semantics = [#tpu.dimension_semantics<arbitrary>, #tpu.dimension_semantics<arbitrary>], iteration_bounds = array<i64: 3, 1>, scalar_prefetch = 0 : i64, scratch_operands = 7 : i64, tpu.core_type = #tpu.core_type<tc>, window_params = [{transform_indices = @transform_0, window_bounds = array<i64: 2, 8, 256>}, {pipeline_mode = #tpu.pipeline_mode<synchronous>, transform_indices = @transform_1, window_bounds = array<i64: 8, 512>}, {pipeline_mode = #tpu.pipeline_mode<synchronous>, transform_indices = @transform_2, window_bounds = array<i64: 8, 72>}, {pipeline_mode = #tpu.pipeline_mode<synchronous>, transform_indices = @transform_3, window_bounds = array<i64: 8, 1>}, {pipeline_mode = #tpu.pipeline_mode<synchronous>, transform_indices = @transform_4, window_bounds = array<i64: 8, 1>}, {pipeline_mode = #tpu.pipeline_mode<synchronous>, transform_indices = @transform_5, window_bounds = array<i64: 8, 72>}, {pipeline_mode = #tpu.pipeline_mode<synchronous>, transform_indices = @transform_6, window_bounds = array<i64: 8, 1>}, {pipeline_mode = #tpu.pipeline_mode<synchronous>, transform_indices = @transform_7, window_bounds = array<i64: 8, 1>}, {transform_indices = @transform_8, window_bounds = array<i64: 2, 8, 256>}]} {
    %c0_i32 = arith.constant 0 : i32
    %0 = arith.cmpi eq, %arg0, %c0_i32 : i32
    %c0_i32_0 = arith.constant 0 : i32
    %1 = arith.cmpi eq, %arg1, %c0_i32_0 : i32
    %2 = arith.andi %0, %1 : i1
    %3 = arith.extui %2 : i1 to i32
    %c0_i32_1 = arith.constant 0 : i32
    %4 = arith.cmpi ne, %3, %c0_i32_1 : i32
    scf.if %4 {
      %cst = arith.constant 0.000000e+00 : f32
      %14 = vector.broadcast %cst : f32 to vector<8x1xf32>
      %c0 = arith.constant 0 : index
      %c0_6 = arith.constant 0 : index
      %15 = vector.load %arg14[%c0, %c0_6] : memref<8x1xf32, #tpu.memory_space<vmem>>, vector<8x1xf32>
      tpu.vector_store %arg14[%c0, %c0_6], %14 {strides = array<i32>} : memref<8x1xf32, #tpu.memory_space<vmem>>, vector<8x1xf32>,
      %cst_7 = arith.constant 0.000000e+00 : f32
      %16 = vector.broadcast %cst_7 : f32 to vector<8x1xf32>
      %c0_8 = arith.constant 0 : index
      %c0_9 = arith.constant 0 : index
      %17 = vector.load %arg15[%c0_8, %c0_9] : memref<8x1xf32, #tpu.memory_space<vmem>>, vector<8x1xf32>
      tpu.vector_store %arg15[%c0_8, %c0_9], %16 {strides = array<i32>} : memref<8x1xf32, #tpu.memory_space<vmem>>, vector<8x1xf32>,
      %cst_10 = arith.constant 0.000000e+00 : f32
      %18 = vector.broadcast %cst_10 : f32 to vector<8x1xf32>
      %c0_11 = arith.constant 0 : index
      %c0_12 = arith.constant 0 : index
      %19 = vector.load %arg16[%c0_11, %c0_12] : memref<8x1xf32, #tpu.memory_space<vmem>>, vector<8x1xf32>
      tpu.vector_store %arg16[%c0_11, %c0_12], %18 {strides = array<i32>} : memref<8x1xf32, #tpu.memory_space<vmem>>, vector<8x1xf32>,
      %cst_13 = arith.constant 0.000000e+00 : f32
      %20 = vector.broadcast %cst_13 : f32 to vector<8x1xf32>
      %c0_14 = arith.constant 0 : index
      %c0_15 = arith.constant 0 : index
      %21 = vector.load %arg17[%c0_14, %c0_15] : memref<8x1xf32, #tpu.memory_space<vmem>>, vector<8x1xf32>
      tpu.vector_store %arg17[%c0_14, %c0_15], %20 {strides = array<i32>} : memref<8x1xf32, #tpu.memory_space<vmem>>, vector<8x1xf32>,
    } else {
    }
    %c0_i32_2 = arith.constant 0 : i32
    %5 = arith.cmpi eq, %arg0, %c0_i32_2 : i32
    %6 = arith.extui %5 : i1 to i32
    %c0_i32_3 = arith.constant 0 : i32
    %7 = arith.cmpi ne, %6, %c0_i32_3 : i32
    scf.if %7 {
      %c0 = arith.constant 0 : index
      %c0_6 = arith.constant 0 : index
      %c0_7 = arith.constant 0 : index
      %14 = vector.load %arg2[%c0, %c0_6, %c0_7] : memref<2x8x256xf32, #tpu.memory_space<vmem>>, vector<1x8x256xf32>
      %15 = vector.shape_cast %14 : vector<1x8x256xf32> to vector<8x256xf32>
      %c1 = arith.constant 1 : index
      %c0_8 = arith.constant 0 : index
      %c0_9 = arith.constant 0 : index
      %16 = vector.load %arg2[%c1, %c0_8, %c0_9] : memref<2x8x256xf32, #tpu.memory_space<vmem>>, vector<1x8x256xf32>
      %17 = vector.shape_cast %16 : vector<1x8x256xf32> to vector<8x256xf32>
      %18 = tpu.concatenate %15, %17 in 1 : vector<8x256xf32>, vector<8x256xf32> -> vector<8x512xf32>
      %c0_10 = arith.constant 0 : index
      %c0_11 = arith.constant 0 : index
      %19 = vector.load %arg3[%c0_10, %c0_11] : memref<8x512xf32, #tpu.memory_space<vmem>>, vector<8x512xf32>
      %c17_i32 = arith.constant 17 : i32
      %20 = tpu.dynamic_rotate %18 by %c17_i32 dim 1 : vector<8x512xf32>, i32 -> vector<8x512xf32>
      %21 = vector.extract_strided_slice %19 {offsets = [0, 0], sizes = [1, 512], strides = [1, 1]} : vector<8x512xf32> to vector<1x512xf32>
      %22 = vector.broadcast %21 : vector<1x512xf32> to vector<8x512xf32>
      %23 = arith.mulf %20, %22 : vector<8x512xf32>
      %c0_12 = arith.constant 0 : index
      %c0_13 = arith.constant 0 : index
      %24 = vector.load %arg13[%c0_12, %c0_13] : memref<72x512xf32, #tpu.memory_space<vmem>>, vector<8x512xf32>
      tpu.vector_store %arg13[%c0_12, %c0_13], %23 {strides = array<i32>} : memref<72x512xf32, #tpu.memory_space<vmem>>, vector<8x512xf32>,
      %c16_i32 = arith.constant 16 : i32
      %25 = tpu.dynamic_rotate %18 by %c16_i32 dim 1 : vector<8x512xf32>, i32 -> vector<8x512xf32>
      %26 = vector.extract_strided_slice %19 {offsets = [1, 0], sizes = [1, 512], strides = [1, 1]} : vector<8x512xf32> to vector<1x512xf32>
      %27 = vector.broadcast %26 : vector<1x512xf32> to vector<8x512xf32>
      %28 = arith.mulf %25, %27 : vector<8x512xf32>
      %c8 = arith.constant 8 : index
      %c0_14 = arith.constant 0 : index
      %29 = vector.load %arg13[%c8, %c0_14] : memref<72x512xf32, #tpu.memory_space<vmem>>, vector<8x512xf32>
      tpu.vector_store %arg13[%c8, %c0_14], %28 {strides = array<i32>} : memref<72x512xf32, #tpu.memory_space<vmem>>, vector<8x512xf32>,
      %c15_i32 = arith.constant 15 : i32
      %30 = tpu.dynamic_rotate %18 by %c15_i32 dim 1 : vector<8x512xf32>, i32 -> vector<8x512xf32>
      %31 = vector.extract_strided_slice %19 {offsets = [2, 0], sizes = [1, 512], strides = [1, 1]} : vector<8x512xf32> to vector<1x512xf32>
      %32 = vector.broadcast %31 : vector<1x512xf32> to vector<8x512xf32>
      %33 = arith.mulf %30, %32 : vector<8x512xf32>
      %c16 = arith.constant 16 : index
      %c0_15 = arith.constant 0 : index
      %34 = vector.load %arg13[%c16, %c0_15] : memref<72x512xf32, #tpu.memory_space<vmem>>, vector<8x512xf32>
      tpu.vector_store %arg13[%c16, %c0_15], %33 {strides = array<i32>} : memref<72x512xf32, #tpu.memory_space<vmem>>, vector<8x512xf32>,
      %c1_i32_16 = arith.constant 1 : i32
      %35 = tpu.dynamic_rotate %18 by %c1_i32_16 dim 1 : vector<8x512xf32>, i32 -> vector<8x512xf32>
      %36 = vector.extract_strided_slice %19 {offsets = [3, 0], sizes = [1, 512], strides = [1, 1]} : vector<8x512xf32> to vector<1x512xf32>
      %37 = vector.broadcast %36 : vector<1x512xf32> to vector<8x512xf32>
      %38 = arith.mulf %35, %37 : vector<8x512xf32>
      %c24 = arith.constant 24 : index
      %c0_17 = arith.constant 0 : index
      %39 = vector.load %arg13[%c24, %c0_17] : memref<72x512xf32, #tpu.memory_space<vmem>>, vector<8x512xf32>
      tpu.vector_store %arg13[%c24, %c0_17], %38 {strides = array<i32>} : memref<72x512xf32, #tpu.memory_space<vmem>>, vector<8x512xf32>,
      %c32 = arith.constant 32 : index
      %c0_18 = arith.constant 0 : index
      %40 = vector.load %arg13[%c32, %c0_18] : memref<72x512xf32, #tpu.memory_space<vmem>>, vector<8x512xf32>
      tpu.vector_store %arg13[%c32, %c0_18], %18 {strides = array<i32>} : memref<72x512xf32, #tpu.memory_space<vmem>>, vector<8x512xf32>,
      %c511_i32 = arith.constant 511 : i32
      %41 = tpu.dynamic_rotate %18 by %c511_i32 dim 1 : vector<8x512xf32>, i32 -> vector<8x512xf32>
      %42 = vector.extract_strided_slice %19 {offsets = [4, 0], sizes = [1, 512], strides = [1, 1]} : vector<8x512xf32> to vector<1x512xf32>
      %43 = vector.broadcast %42 : vector<1x512xf32> to vector<8x512xf32>
      %44 = arith.mulf %41, %43 : vector<8x512xf32>
      %c40 = arith.constant 40 : index
      %c0_19 = arith.constant 0 : index
      %45 = vector.load %arg13[%c40, %c0_19] : memref<72x512xf32, #tpu.memory_space<vmem>>, vector<8x512xf32>
      tpu.vector_store %arg13[%c40, %c0_19], %44 {strides = array<i32>} : memref<72x512xf32, #tpu.memory_space<vmem>>, vector<8x512xf32>,
      %c497_i32 = arith.constant 497 : i32
      %46 = tpu.dynamic_rotate %18 by %c497_i32 dim 1 : vector<8x512xf32>, i32 -> vector<8x512xf32>
      %47 = vector.extract_strided_slice %19 {offsets = [5, 0], sizes = [1, 512], strides = [1, 1]} : vector<8x512xf32> to vector<1x512xf32>
      %48 = vector.broadcast %47 : vector<1x512xf32> to vector<8x512xf32>
      %49 = arith.mulf %46, %48 : vector<8x512xf32>
      %c48 = arith.constant 48 : index
      %c0_20 = arith.constant 0 : index
      %50 = vector.load %arg13[%c48, %c0_20] : memref<72x512xf32, #tpu.memory_space<vmem>>, vector<8x512xf32>
      tpu.vector_store %arg13[%c48, %c0_20], %49 {strides = array<i32>} : memref<72x512xf32, #tpu.memory_space<vmem>>, vector<8x512xf32>,
      %c496_i32 = arith.constant 496 : i32
      %51 = tpu.dynamic_rotate %18 by %c496_i32 dim 1 : vector<8x512xf32>, i32 -> vector<8x512xf32>
      %52 = vector.extract_strided_slice %19 {offsets = [6, 0], sizes = [1, 512], strides = [1, 1]} : vector<8x512xf32> to vector<1x512xf32>
      %53 = vector.broadcast %52 : vector<1x512xf32> to vector<8x512xf32>
      %54 = arith.mulf %51, %53 : vector<8x512xf32>
      %c56 = arith.constant 56 : index
      %c0_21 = arith.constant 0 : index
      %55 = vector.load %arg13[%c56, %c0_21] : memref<72x512xf32, #tpu.memory_space<vmem>>, vector<8x512xf32>
      tpu.vector_store %arg13[%c56, %c0_21], %54 {strides = array<i32>} : memref<72x512xf32, #tpu.memory_space<vmem>>, vector<8x512xf32>,
      %c495_i32 = arith.constant 495 : i32
      %56 = tpu.dynamic_rotate %18 by %c495_i32 dim 1 : vector<8x512xf32>, i32 -> vector<8x512xf32>
      %57 = vector.extract_strided_slice %19 {offsets = [7, 0], sizes = [1, 512], strides = [1, 1]} : vector<8x512xf32> to vector<1x512xf32>
      %58 = vector.broadcast %57 : vector<1x512xf32> to vector<8x512xf32>
      %59 = arith.mulf %56, %58 : vector<8x512xf32>
      %c64 = arith.constant 64 : index
      %c0_22 = arith.constant 0 : index
      %60 = vector.load %arg13[%c64, %c0_22] : memref<72x512xf32, #tpu.memory_space<vmem>>, vector<8x512xf32>
      tpu.vector_store %arg13[%c64, %c0_22], %59 {strides = array<i32>} : memref<72x512xf32, #tpu.memory_space<vmem>>, vector<8x512xf32>,
      %c0_23 = arith.constant 0 : index
      %c0_24 = arith.constant 0 : index
      %61 = vector.load %arg4[%c0_23, %c0_24] : memref<8x72xf32, #tpu.memory_space<vmem>>, vector<8x72xf32>
      %c0_25 = arith.constant 0 : index
      %c0_26 = arith.constant 0 : index
      %62 = vector.load %arg13[%c0_25, %c0_26] : memref<72x512xf32, #tpu.memory_space<vmem>>, vector<72x512xf32>
      %cst = arith.constant dense<0.000000e+00> : vector<8x512xf32>
      %63 = tpu.matmul %61, %62, %cst {dimension_numbers = #tpu.dot_dimension_numbers<[1], [0], [0], [1], [0, 0, 1, 1], [], []>} : vector<8x72xf32>, vector<72x512xf32>, vector<8x512xf32> -> vector<8x512xf32>
      %64 = arith.index_cast %arg1 : i32 to index
      %c0_27 = arith.constant 0 : index
      %c0_28 = arith.constant 0 : index
      %65 = vector.load %arg11[%64, %c0_27, %c0_28] : memref<1x8x512xf32, #tpu.memory_space<vmem>>, vector<1x8x512xf32>
      %66 = vector.shape_cast %65 : vector<1x8x512xf32> to vector<8x512xf32>
      %67 = vector.shape_cast %63 : vector<8x512xf32> to vector<1x8x512xf32>
      tpu.vector_store %arg11[%64, %c0_27, %c0_28], %67 {strides = array<i32>} : memref<1x8x512xf32, #tpu.memory_space<vmem>>, vector<1x8x512xf32>,
      %cst_29 = arith.constant 1.000000e+00 : f32
      %68 = vector.broadcast %cst_29 : f32 to vector<512x1xf32>
      %c0_30 = arith.constant 0 : index
      %c0_31 = arith.constant 0 : index
      %69 = vector.load %arg14[%c0_30, %c0_31] : memref<8x1xf32, #tpu.memory_space<vmem>>, vector<8x1xf32>
      %cst_32 = arith.constant dense<0.000000e+00> : vector<8x1xf32>
      %70 = tpu.matmul %63, %68, %cst_32 {dimension_numbers = #tpu.dot_dimension_numbers<[1], [0], [0], [1], [0, 0, 1, 1], [], []>} : vector<8x512xf32>, vector<512x1xf32>, vector<8x1xf32> -> vector<8x1xf32>
      %71 = arith.addf %69, %70 : vector<8x1xf32>
      %c0_33 = arith.constant 0 : index
      %c0_34 = arith.constant 0 : index
      %72 = vector.load %arg14[%c0_33, %c0_34] : memref<8x1xf32, #tpu.memory_space<vmem>>, vector<8x1xf32>
      tpu.vector_store %arg14[%c0_33, %c0_34], %71 {strides = array<i32>} : memref<8x1xf32, #tpu.memory_space<vmem>>, vector<8x1xf32>,
      %c0_35 = arith.constant 0 : index
      %c0_36 = arith.constant 0 : index
      %73 = vector.load %arg15[%c0_35, %c0_36] : memref<8x1xf32, #tpu.memory_space<vmem>>, vector<8x1xf32>
      %74 = arith.mulf %63, %63 : vector<8x512xf32>
      %cst_37 = arith.constant dense<0.000000e+00> : vector<8x1xf32>
      %75 = tpu.matmul %74, %68, %cst_37 {dimension_numbers = #tpu.dot_dimension_numbers<[1], [0], [0], [1], [0, 0, 1, 1], [], []>} : vector<8x512xf32>, vector<512x1xf32>, vector<8x1xf32> -> vector<8x1xf32>
      %76 = arith.addf %73, %75 : vector<8x1xf32>
      %c0_38 = arith.constant 0 : index
      %c0_39 = arith.constant 0 : index
      %77 = vector.load %arg15[%c0_38, %c0_39] : memref<8x1xf32, #tpu.memory_space<vmem>>, vector<8x1xf32>
      tpu.vector_store %arg15[%c0_38, %c0_39], %76 {strides = array<i32>} : memref<8x1xf32, #tpu.memory_space<vmem>>, vector<8x1xf32>,
    } else {
    }
    %c1_i32 = arith.constant 1 : i32
    %8 = arith.cmpi eq, %arg0, %c1_i32 : i32
    %9 = arith.extui %8 : i1 to i32
    %c0_i32_4 = arith.constant 0 : i32
    %10 = arith.cmpi ne, %9, %c0_i32_4 : i32
    scf.if %10 {
      %c0 = arith.constant 0 : index
      %c0_6 = arith.constant 0 : index
      %14 = vector.load %arg14[%c0, %c0_6] : memref<8x1xf32, #tpu.memory_space<vmem>>, vector<8x1xf32>
      %cst = arith.constant 0.001953125 : f32
      %15 = vector.broadcast %cst : f32 to vector<8x1xf32>
      %16 = arith.mulf %14, %15 : vector<8x1xf32>
      %c0_7 = arith.constant 0 : index
      %c0_8 = arith.constant 0 : index
      %17 = vector.load %arg15[%c0_7, %c0_8] : memref<8x1xf32, #tpu.memory_space<vmem>>, vector<8x1xf32>
      %cst_9 = arith.constant 0.001953125 : f32
      %18 = vector.broadcast %cst_9 : f32 to vector<8x1xf32>
      %19 = arith.mulf %17, %18 : vector<8x1xf32>
      %20 = arith.mulf %16, %16 : vector<8x1xf32>
      %21 = arith.subf %19, %20 : vector<8x1xf32>
      %cst_10 = arith.constant 0.000000e+00 : f32
      %22 = vector.broadcast %cst_10 : f32 to vector<8x1xf32>
      %23 = arith.maximumf %21, %22 : vector<8x1xf32>
      %c0_11 = arith.constant 0 : index
      %c0_12 = arith.constant 0 : index
      %24 = vector.load %arg5[%c0_11, %c0_12] : memref<8x1xf32, #tpu.memory_space<vmem>>, vector<8x1xf32>
      %cst_13 = arith.constant 9.99999974E-6 : f32
      %25 = vector.broadcast %cst_13 : f32 to vector<8x1xf32>
      %26 = arith.addf %23, %25 : vector<8x1xf32>
      %27 = math.rsqrt %26 : vector<8x1xf32>
      %28 = arith.mulf %24, %27 : vector<8x1xf32>
      %c0_14 = arith.constant 0 : index
      %c0_15 = arith.constant 0 : index
      %29 = vector.load %arg6[%c0_14, %c0_15] : memref<8x1xf32, #tpu.memory_space<vmem>>, vector<8x1xf32>
      %30 = arith.mulf %16, %28 : vector<8x1xf32>
      %31 = arith.subf %29, %30 : vector<8x1xf32>
      %32 = arith.index_cast %arg1 : i32 to index
      %c0_16 = arith.constant 0 : index
      %c0_17 = arith.constant 0 : index
      %33 = vector.load %arg11[%32, %c0_16, %c0_17] : memref<1x8x512xf32, #tpu.memory_space<vmem>>, vector<1x8x512xf32>
      %34 = vector.shape_cast %33 : vector<1x8x512xf32> to vector<8x512xf32>
      %35 = vector.broadcast %28 : vector<8x1xf32> to vector<8x512xf32>
      %36 = arith.mulf %34, %35 : vector<8x512xf32>
      %37 = vector.broadcast %31 : vector<8x1xf32> to vector<8x512xf32>
      %38 = arith.addf %36, %37 : vector<8x512xf32>
      %cst_18 = arith.constant 0.000000e+00 : f32
      %39 = vector.broadcast %cst_18 : f32 to vector<8x512xf32>
      %40 = arith.maximumf %38, %39 : vector<8x512xf32>
      %c0_19 = arith.constant 0 : index
      %c0_20 = arith.constant 0 : index
      %41 = vector.load %arg3[%c0_19, %c0_20] : memref<8x512xf32, #tpu.memory_space<vmem>>, vector<8x512xf32>
      %c17_i32 = arith.constant 17 : i32
      %42 = tpu.dynamic_rotate %40 by %c17_i32 dim 1 : vector<8x512xf32>, i32 -> vector<8x512xf32>
      %43 = vector.extract_strided_slice %41 {offsets = [0, 0], sizes = [1, 512], strides = [1, 1]} : vector<8x512xf32> to vector<1x512xf32>
      %44 = vector.broadcast %43 : vector<1x512xf32> to vector<8x512xf32>
      %45 = arith.mulf %42, %44 : vector<8x512xf32>
      %c0_21 = arith.constant 0 : index
      %c0_22 = arith.constant 0 : index
      %46 = vector.load %arg13[%c0_21, %c0_22] : memref<72x512xf32, #tpu.memory_space<vmem>>, vector<8x512xf32>
      tpu.vector_store %arg13[%c0_21, %c0_22], %45 {strides = array<i32>} : memref<72x512xf32, #tpu.memory_space<vmem>>, vector<8x512xf32>,
      %c16_i32 = arith.constant 16 : i32
      %47 = tpu.dynamic_rotate %40 by %c16_i32 dim 1 : vector<8x512xf32>, i32 -> vector<8x512xf32>
      %48 = vector.extract_strided_slice %41 {offsets = [1, 0], sizes = [1, 512], strides = [1, 1]} : vector<8x512xf32> to vector<1x512xf32>
      %49 = vector.broadcast %48 : vector<1x512xf32> to vector<8x512xf32>
      %50 = arith.mulf %47, %49 : vector<8x512xf32>
      %c8 = arith.constant 8 : index
      %c0_23 = arith.constant 0 : index
      %51 = vector.load %arg13[%c8, %c0_23] : memref<72x512xf32, #tpu.memory_space<vmem>>, vector<8x512xf32>
      tpu.vector_store %arg13[%c8, %c0_23], %50 {strides = array<i32>} : memref<72x512xf32, #tpu.memory_space<vmem>>, vector<8x512xf32>,
      %c15_i32 = arith.constant 15 : i32
      %52 = tpu.dynamic_rotate %40 by %c15_i32 dim 1 : vector<8x512xf32>, i32 -> vector<8x512xf32>
      %53 = vector.extract_strided_slice %41 {offsets = [2, 0], sizes = [1, 512], strides = [1, 1]} : vector<8x512xf32> to vector<1x512xf32>
      %54 = vector.broadcast %53 : vector<1x512xf32> to vector<8x512xf32>
      %55 = arith.mulf %52, %54 : vector<8x512xf32>
      %c16 = arith.constant 16 : index
      %c0_24 = arith.constant 0 : index
      %56 = vector.load %arg13[%c16, %c0_24] : memref<72x512xf32, #tpu.memory_space<vmem>>, vector<8x512xf32>
      tpu.vector_store %arg13[%c16, %c0_24], %55 {strides = array<i32>} : memref<72x512xf32, #tpu.memory_space<vmem>>, vector<8x512xf32>,
      %c1_i32_25 = arith.constant 1 : i32
      %57 = tpu.dynamic_rotate %40 by %c1_i32_25 dim 1 : vector<8x512xf32>, i32 -> vector<8x512xf32>
      %58 = vector.extract_strided_slice %41 {offsets = [3, 0], sizes = [1, 512], strides = [1, 1]} : vector<8x512xf32> to vector<1x512xf32>
      %59 = vector.broadcast %58 : vector<1x512xf32> to vector<8x512xf32>
      %60 = arith.mulf %57, %59 : vector<8x512xf32>
      %c24 = arith.constant 24 : index
      %c0_26 = arith.constant 0 : index
      %61 = vector.load %arg13[%c24, %c0_26] : memref<72x512xf32, #tpu.memory_space<vmem>>, vector<8x512xf32>
      tpu.vector_store %arg13[%c24, %c0_26], %60 {strides = array<i32>} : memref<72x512xf32, #tpu.memory_space<vmem>>, vector<8x512xf32>,
      %c32 = arith.constant 32 : index
      %c0_27 = arith.constant 0 : index
      %62 = vector.load %arg13[%c32, %c0_27] : memref<72x512xf32, #tpu.memory_space<vmem>>, vector<8x512xf32>
      tpu.vector_store %arg13[%c32, %c0_27], %40 {strides = array<i32>} : memref<72x512xf32, #tpu.memory_space<vmem>>, vector<8x512xf32>,
      %c511_i32 = arith.constant 511 : i32
      %63 = tpu.dynamic_rotate %40 by %c511_i32 dim 1 : vector<8x512xf32>, i32 -> vector<8x512xf32>
      %64 = vector.extract_strided_slice %41 {offsets = [4, 0], sizes = [1, 512], strides = [1, 1]} : vector<8x512xf32> to vector<1x512xf32>
      %65 = vector.broadcast %64 : vector<1x512xf32> to vector<8x512xf32>
      %66 = arith.mulf %63, %65 : vector<8x512xf32>
      %c40 = arith.constant 40 : index
      %c0_28 = arith.constant 0 : index
      %67 = vector.load %arg13[%c40, %c0_28] : memref<72x512xf32, #tpu.memory_space<vmem>>, vector<8x512xf32>
      tpu.vector_store %arg13[%c40, %c0_28], %66 {strides = array<i32>} : memref<72x512xf32, #tpu.memory_space<vmem>>, vector<8x512xf32>,
      %c497_i32 = arith.constant 497 : i32
      %68 = tpu.dynamic_rotate %40 by %c497_i32 dim 1 : vector<8x512xf32>, i32 -> vector<8x512xf32>
      %69 = vector.extract_strided_slice %41 {offsets = [5, 0], sizes = [1, 512], strides = [1, 1]} : vector<8x512xf32> to vector<1x512xf32>
      %70 = vector.broadcast %69 : vector<1x512xf32> to vector<8x512xf32>
      %71 = arith.mulf %68, %70 : vector<8x512xf32>
      %c48 = arith.constant 48 : index
      %c0_29 = arith.constant 0 : index
      %72 = vector.load %arg13[%c48, %c0_29] : memref<72x512xf32, #tpu.memory_space<vmem>>, vector<8x512xf32>
      tpu.vector_store %arg13[%c48, %c0_29], %71 {strides = array<i32>} : memref<72x512xf32, #tpu.memory_space<vmem>>, vector<8x512xf32>,
      %c496_i32 = arith.constant 496 : i32
      %73 = tpu.dynamic_rotate %40 by %c496_i32 dim 1 : vector<8x512xf32>, i32 -> vector<8x512xf32>
      %74 = vector.extract_strided_slice %41 {offsets = [6, 0], sizes = [1, 512], strides = [1, 1]} : vector<8x512xf32> to vector<1x512xf32>
      %75 = vector.broadcast %74 : vector<1x512xf32> to vector<8x512xf32>
      %76 = arith.mulf %73, %75 : vector<8x512xf32>
      %c56 = arith.constant 56 : index
      %c0_30 = arith.constant 0 : index
      %77 = vector.load %arg13[%c56, %c0_30] : memref<72x512xf32, #tpu.memory_space<vmem>>, vector<8x512xf32>
      tpu.vector_store %arg13[%c56, %c0_30], %76 {strides = array<i32>} : memref<72x512xf32, #tpu.memory_space<vmem>>, vector<8x512xf32>,
      %c495_i32 = arith.constant 495 : i32
      %78 = tpu.dynamic_rotate %40 by %c495_i32 dim 1 : vector<8x512xf32>, i32 -> vector<8x512xf32>
      %79 = vector.extract_strided_slice %41 {offsets = [7, 0], sizes = [1, 512], strides = [1, 1]} : vector<8x512xf32> to vector<1x512xf32>
      %80 = vector.broadcast %79 : vector<1x512xf32> to vector<8x512xf32>
      %81 = arith.mulf %78, %80 : vector<8x512xf32>
      %c64 = arith.constant 64 : index
      %c0_31 = arith.constant 0 : index
      %82 = vector.load %arg13[%c64, %c0_31] : memref<72x512xf32, #tpu.memory_space<vmem>>, vector<8x512xf32>
      tpu.vector_store %arg13[%c64, %c0_31], %81 {strides = array<i32>} : memref<72x512xf32, #tpu.memory_space<vmem>>, vector<8x512xf32>,
      %c0_32 = arith.constant 0 : index
      %c0_33 = arith.constant 0 : index
      %83 = vector.load %arg7[%c0_32, %c0_33] : memref<8x72xf32, #tpu.memory_space<vmem>>, vector<8x72xf32>
      %c0_34 = arith.constant 0 : index
      %c0_35 = arith.constant 0 : index
      %84 = vector.load %arg13[%c0_34, %c0_35] : memref<72x512xf32, #tpu.memory_space<vmem>>, vector<72x512xf32>
      %cst_36 = arith.constant dense<0.000000e+00> : vector<8x512xf32>
      %85 = tpu.matmul %83, %84, %cst_36 {dimension_numbers = #tpu.dot_dimension_numbers<[1], [0], [0], [1], [0, 0, 1, 1], [], []>} : vector<8x72xf32>, vector<72x512xf32>, vector<8x512xf32> -> vector<8x512xf32>
      %86 = arith.index_cast %arg1 : i32 to index
      %c0_37 = arith.constant 0 : index
      %c0_38 = arith.constant 0 : index
      %87 = vector.load %arg12[%86, %c0_37, %c0_38] : memref<1x8x512xf32, #tpu.memory_space<vmem>>, vector<1x8x512xf32>
      %88 = vector.shape_cast %87 : vector<1x8x512xf32> to vector<8x512xf32>
      %89 = vector.shape_cast %85 : vector<8x512xf32> to vector<1x8x512xf32>
      tpu.vector_store %arg12[%86, %c0_37, %c0_38], %89 {strides = array<i32>} : memref<1x8x512xf32, #tpu.memory_space<vmem>>, vector<1x8x512xf32>,
      %cst_39 = arith.constant 1.000000e+00 : f32
      %90 = vector.broadcast %cst_39 : f32 to vector<512x1xf32>
      %c0_40 = arith.constant 0 : index
      %c0_41 = arith.constant 0 : index
      %91 = vector.load %arg16[%c0_40, %c0_41] : memref<8x1xf32, #tpu.memory_space<vmem>>, vector<8x1xf32>
      %cst_42 = arith.constant dense<0.000000e+00> : vector<8x1xf32>
      %92 = tpu.matmul %85, %90, %cst_42 {dimension_numbers = #tpu.dot_dimension_numbers<[1], [0], [0], [1], [0, 0, 1, 1], [], []>} : vector<8x512xf32>, vector<512x1xf32>, vector<8x1xf32> -> vector<8x1xf32>
      %93 = arith.addf %91, %92 : vector<8x1xf32>
      %c0_43 = arith.constant 0 : index
      %c0_44 = arith.constant 0 : index
      %94 = vector.load %arg16[%c0_43, %c0_44] : memref<8x1xf32, #tpu.memory_space<vmem>>, vector<8x1xf32>
      tpu.vector_store %arg16[%c0_43, %c0_44], %93 {strides = array<i32>} : memref<8x1xf32, #tpu.memory_space<vmem>>, vector<8x1xf32>,
      %c0_45 = arith.constant 0 : index
      %c0_46 = arith.constant 0 : index
      %95 = vector.load %arg17[%c0_45, %c0_46] : memref<8x1xf32, #tpu.memory_space<vmem>>, vector<8x1xf32>
      %96 = arith.mulf %85, %85 : vector<8x512xf32>
      %cst_47 = arith.constant dense<0.000000e+00> : vector<8x1xf32>
      %97 = tpu.matmul %96, %90, %cst_47 {dimension_numbers = #tpu.dot_dimension_numbers<[1], [0], [0], [1], [0, 0, 1, 1], [], []>} : vector<8x512xf32>, vector<512x1xf32>, vector<8x1xf32> -> vector<8x1xf32>
      %98 = arith.addf %95, %97 : vector<8x1xf32>
      %c0_48 = arith.constant 0 : index
      %c0_49 = arith.constant 0 : index
      %99 = vector.load %arg17[%c0_48, %c0_49] : memref<8x1xf32, #tpu.memory_space<vmem>>, vector<8x1xf32>
      tpu.vector_store %arg17[%c0_48, %c0_49], %98 {strides = array<i32>} : memref<8x1xf32, #tpu.memory_space<vmem>>, vector<8x1xf32>,
    } else {
    }
    %c2_i32 = arith.constant 2 : i32
    %11 = arith.cmpi eq, %arg0, %c2_i32 : i32
    %12 = arith.extui %11 : i1 to i32
    %c0_i32_5 = arith.constant 0 : i32
    %13 = arith.cmpi ne, %12, %c0_i32_5 : i32
    scf.if %13 {
      %c0 = arith.constant 0 : index
      %c0_6 = arith.constant 0 : index
      %14 = vector.load %arg16[%c0, %c0_6] : memref<8x1xf32, #tpu.memory_space<vmem>>, vector<8x1xf32>
      %cst = arith.constant 0.001953125 : f32
      %15 = vector.broadcast %cst : f32 to vector<8x1xf32>
      %16 = arith.mulf %14, %15 : vector<8x1xf32>
      %c0_7 = arith.constant 0 : index
      %c0_8 = arith.constant 0 : index
      %17 = vector.load %arg17[%c0_7, %c0_8] : memref<8x1xf32, #tpu.memory_space<vmem>>, vector<8x1xf32>
      %cst_9 = arith.constant 0.001953125 : f32
      %18 = vector.broadcast %cst_9 : f32 to vector<8x1xf32>
      %19 = arith.mulf %17, %18 : vector<8x1xf32>
      %20 = arith.mulf %16, %16 : vector<8x1xf32>
      %21 = arith.subf %19, %20 : vector<8x1xf32>
      %cst_10 = arith.constant 0.000000e+00 : f32
      %22 = vector.broadcast %cst_10 : f32 to vector<8x1xf32>
      %23 = arith.maximumf %21, %22 : vector<8x1xf32>
      %c0_11 = arith.constant 0 : index
      %c0_12 = arith.constant 0 : index
      %24 = vector.load %arg8[%c0_11, %c0_12] : memref<8x1xf32, #tpu.memory_space<vmem>>, vector<8x1xf32>
      %cst_13 = arith.constant 9.99999974E-6 : f32
      %25 = vector.broadcast %cst_13 : f32 to vector<8x1xf32>
      %26 = arith.addf %23, %25 : vector<8x1xf32>
      %27 = math.rsqrt %26 : vector<8x1xf32>
      %28 = arith.mulf %24, %27 : vector<8x1xf32>
      %c0_14 = arith.constant 0 : index
      %c0_15 = arith.constant 0 : index
      %29 = vector.load %arg9[%c0_14, %c0_15] : memref<8x1xf32, #tpu.memory_space<vmem>>, vector<8x1xf32>
      %30 = arith.mulf %16, %28 : vector<8x1xf32>
      %31 = arith.subf %29, %30 : vector<8x1xf32>
      %32 = arith.index_cast %arg1 : i32 to index
      %c0_16 = arith.constant 0 : index
      %c0_17 = arith.constant 0 : index
      %33 = vector.load %arg12[%32, %c0_16, %c0_17] : memref<1x8x512xf32, #tpu.memory_space<vmem>>, vector<1x8x512xf32>
      %34 = vector.shape_cast %33 : vector<1x8x512xf32> to vector<8x512xf32>
      %35 = vector.broadcast %28 : vector<8x1xf32> to vector<8x512xf32>
      %36 = arith.mulf %34, %35 : vector<8x512xf32>
      %37 = vector.broadcast %31 : vector<8x1xf32> to vector<8x512xf32>
      %38 = arith.addf %36, %37 : vector<8x512xf32>
      %cst_18 = arith.constant 0.000000e+00 : f32
      %39 = vector.broadcast %cst_18 : f32 to vector<8x512xf32>
      %40 = arith.maximumf %38, %39 : vector<8x512xf32>
      %41 = vector.extract_strided_slice %40 {offsets = [0, 0], sizes = [8, 256], strides = [1, 1]} : vector<8x512xf32> to vector<8x256xf32>
      %c0_19 = arith.constant 0 : index
      %c0_20 = arith.constant 0 : index
      %c0_21 = arith.constant 0 : index
      %42 = vector.load %arg10[%c0_19, %c0_20, %c0_21] : memref<2x8x256xf32, #tpu.memory_space<vmem>>, vector<1x8x256xf32>
      %43 = vector.shape_cast %42 : vector<1x8x256xf32> to vector<8x256xf32>
      %44 = vector.shape_cast %41 : vector<8x256xf32> to vector<1x8x256xf32>
      tpu.vector_store %arg10[%c0_19, %c0_20, %c0_21], %44 {strides = array<i32>} : memref<2x8x256xf32, #tpu.memory_space<vmem>>, vector<1x8x256xf32>,
      %45 = vector.extract_strided_slice %40 {offsets = [0, 256], sizes = [8, 256], strides = [1, 1]} : vector<8x512xf32> to vector<8x256xf32>
      %c1 = arith.constant 1 : index
      %c0_22 = arith.constant 0 : index
      %c0_23 = arith.constant 0 : index
      %46 = vector.load %arg10[%c1, %c0_22, %c0_23] : memref<2x8x256xf32, #tpu.memory_space<vmem>>, vector<1x8x256xf32>
      %47 = vector.shape_cast %46 : vector<1x8x256xf32> to vector<8x256xf32>
      %48 = vector.shape_cast %45 : vector<8x256xf32> to vector<1x8x256xf32>
      tpu.vector_store %arg10[%c1, %c0_22, %c0_23], %48 {strides = array<i32>} : memref<2x8x256xf32, #tpu.memory_space<vmem>>, vector<1x8x256xf32>,
    } else {
    }
    return
  }
  func.func @transform_0(%arg0: i32, %arg1: i32) -> (i32, i32, i32) {
    %c0_i32 = arith.constant 0 : i32
    %0 = arith.cmpi eq, %arg0, %c0_i32 : i32
    %c0_i32_0 = arith.constant 0 : i32
    %1 = arith.select %0, %arg1, %c0_i32_0 : i32
    %c0_i32_1 = arith.constant 0 : i32
    %c0_i32_2 = arith.constant 0 : i32
    %c0_i32_3 = arith.constant 0 : i32
    return %1, %c0_i32_1, %c0_i32_2 : i32, i32, i32
  }
  func.func @transform_1(%arg0: i32, %arg1: i32) -> (i32, i32) {
    %c0_i32 = arith.constant 0 : i32
    %c0_i32_0 = arith.constant 0 : i32
    %c0_i32_1 = arith.constant 0 : i32
    return %c0_i32, %c0_i32_0 : i32, i32
  }
  func.func @transform_2(%arg0: i32, %arg1: i32) -> (i32, i32) {
    %c0_i32 = arith.constant 0 : i32
    %c0_i32_0 = arith.constant 0 : i32
    %c0_i32_1 = arith.constant 0 : i32
    return %c0_i32, %c0_i32_0 : i32, i32
  }
  func.func @transform_3(%arg0: i32, %arg1: i32) -> (i32, i32) {
    %c0_i32 = arith.constant 0 : i32
    %c0_i32_0 = arith.constant 0 : i32
    %c0_i32_1 = arith.constant 0 : i32
    return %c0_i32, %c0_i32_0 : i32, i32
  }
  func.func @transform_4(%arg0: i32, %arg1: i32) -> (i32, i32) {
    %c0_i32 = arith.constant 0 : i32
    %c0_i32_0 = arith.constant 0 : i32
    %c0_i32_1 = arith.constant 0 : i32
    return %c0_i32, %c0_i32_0 : i32, i32
  }
  func.func @transform_5(%arg0: i32, %arg1: i32) -> (i32, i32) {
    %c0_i32 = arith.constant 0 : i32
    %c0_i32_0 = arith.constant 0 : i32
    %c0_i32_1 = arith.constant 0 : i32
    return %c0_i32, %c0_i32_0 : i32, i32
  }
  func.func @transform_6(%arg0: i32, %arg1: i32) -> (i32, i32) {
    %c0_i32 = arith.constant 0 : i32
    %c0_i32_0 = arith.constant 0 : i32
    %c0_i32_1 = arith.constant 0 : i32
    return %c0_i32, %c0_i32_0 : i32, i32
  }
  func.func @transform_7(%arg0: i32, %arg1: i32) -> (i32, i32) {
    %c0_i32 = arith.constant 0 : i32
    %c0_i32_0 = arith.constant 0 : i32
    %c0_i32_1 = arith.constant 0 : i32
    return %c0_i32, %c0_i32_0 : i32, i32
  }
  func.func @transform_8(%arg0: i32, %arg1: i32) -> (i32, i32, i32) {
    %c2_i32 = arith.constant 2 : i32
    %0 = arith.cmpi eq, %arg0, %c2_i32 : i32
    %c0_i32 = arith.constant 0 : i32
    %1 = arith.select %0, %arg1, %c0_i32 : i32
    %c0_i32_0 = arith.constant 0 : i32
    %c0_i32_1 = arith.constant 0 : i32
    %c0_i32_2 = arith.constant 0 : i32
    return %1, %c0_i32_0, %c0_i32_1 : i32, i32, i32
  }
}

</mosaic_0001>

<bundles_post_ra>
// kernel: double_cov_forward.1
= control target key start
LH: loop header
LB: loop body
LE: loop exit
PB: predicated region body
PF: predicated region fallthrough
CT: control target
= control target key end

     0   :  { %s2762_s27 = smov 0   ;;  %s2764_s28 = smov 0   ;;  %s3317_s0 = inlined_call_operand.vmem [shape: f32[2,8,256], index: 0, kind: input, shape index: {}]   ;;  %s3318_s1 = inlined_call_operand.vmem [shape: f32[8,512], index: 1, kind: input, shape index: {}]   ;;  %s3319_s2 = inlined_call_operand.vmem [shape: f32[8,72], index: 2, kind: input, shape index: {}]   ;;  %s3320_s3 = inlined_call_operand.vmem [shape: f32[8,1], index: 3, kind: input, shape index: {}]   ;;  %s3321_s4 = inlined_call_operand.vmem [shape: f32[8,1], index: 4, kind: input, shape index: {}]   ;;  %s3322_s5 = inlined_call_operand.vmem [shape: f32[8,72], index: 5, kind: input, shape index: {}]   ;;  %s3323_s6 = inlined_call_operand.vmem [shape: f32[8,1], index: 6, kind: input, shape index: {}]   ;;  %s3324_s7 = inlined_call_operand.vmem [shape: f32[8,1], index: 7, kind: input, shape index: {}]   ;;  %s3325_s8 = inlined_call_operand.vmem [shape: f32[2,8,256], index: 8, kind: output, shape index: {}]  }
   0x1   :  { %s2766_s29 = smov 0  }
   0x2 LB: > { %s30_s30 = sadd.s32 1, %s2688_s28  ;;  %p2127_p0 = scmp.ge.s32.totalorder %s2692_s29, 1  ;;  %s2692_s29 = sphi %s2766_s29, %s18_s29   ;;  %s2688_s28 = sphi %s2764_s28, %s3327_s28   ;;  %s2684_s27 = sphi %s2762_s27, %s3326_s27  }
   0x3   : > { %p32_p1 = scmp.ge.s32.totalorder %s30_s30, 3  ;;  %p288_p2 = scmp.lt.s32.totalorder %s2692_s29, 4 }
   0x5   : > { %s3329_s30 = smov (%p32_p1, %s30_s30), 0  ;;  %p289_p3 = pnand %p2127_p0, %p288_p2 }
   0x6   : > { %p350_p4 = scmp.eq.s32.totalorder (!%p289_p3), %s2684_s27, 0 }
   0x7   : > { %292 = sbr.rel (%p289_p3) target bundleno = 1649 (0x671), region = 52 }
   0xe   : > { %355 = sbr.rel (!%p350_p4) target bundleno = 21 (0x15), region = 56  ;;  %vm356_vm0 = vcmask (%p350_p4), 7168   ;;  %v2694_v0 = vmov (%p350_p4), 0.0  }
   0xf   : > { %357 = vst.msk [vmem:[#allocation5] sm:$0xff] (%p350_p4), %vm356_vm0, %v2694_v0  ;;  %358 = vst.msk [vmem:[#allocation6] sm:$0xff] (%p350_p4), %vm356_vm0, %v2694_v0 }
  0x10   : > { %359 = vst.msk [vmem:[#allocation7] sm:$0xff] (%p350_p4), %vm356_vm0, %v2694_v0  ;;  %360 = vst.msk [vmem:[#allocation8] sm:$0xff] (%p350_p4), %vm356_vm0, %v2694_v0 }
  0x15 PF: > { %p2129_p5 = scmp.ne.s32.totalorder %s2684_s27, 0 }
  0x16   : > { %v2787_v1 = vld [vmem:[%s3317_s0 + $0x10] sm:$0xff] (!%p2129_p5)  ;;  %v2792_v2 = vld [vmem:[%s3317_s0] sm:$0xff] (!%p2129_p5)  ;;  %v2797_v3 = vld [vmem:[%s3317_s0 + $0x18] sm:$0xff] (!%p2129_p5)  ;;  %s2695_s15 = smov (!%p2129_p5), 17   ;;  %s2696_s18 = smov (!%p2129_p5), 16   ;;  %v2702_v5 = vmov (!%p2129_p5), 0.0   ;;  %v381_v6 = vlaneseq (!%p2129_p5) }
  0x17   : > { %363 = sbr.rel (%p2129_p5) target bundleno = 669 (0x29d), region = 60  ;;  %377 = vrot.lane.b32.xlu1 (!%p2129_p5), %v2787_v1, %s2695_s15  ;;  %373 = vrot.lane.b32.xlu0 (!%p2129_p5), %v2792_v2, %s2695_s15  ;;  %v2804_v4 = vld [vmem:[%s3317_s0 + $0x8] sm:$0xff] (!%p2129_p5)  ;;  %s2697_s19 = smov (!%p2129_p5), 15   ;;  %v2843_v9 = vld [vmem:[%s3318_s1] sm:$0xff] (!%p2129_p5)  ;;  %vm712_vm9 = vcmask (!%p2129_p5), 588800   ;;  %vm1007_vm10 = vcmask (!%p2129_p5), 7168  }
  0x18   : > { %s2698_s20 = smov (!%p2129_p5), 1   ;;  %s2699_s21 = smov (!%p2129_p5), 127   ;;  %780 = vmatprep.mubr.f32.mxu0 (!%p2129_p5), %v2702_v5  ;;  %851 = vmatprep.mubr.f32.mxu1 (!%p2129_p5), %v2702_v5  ;;  %v2836_v7 = vshrl.u32 (!%p2129_p5), %v381_v6, 7  ;;  %v2838_v8 = vand.u32 (!%p2129_p5), 127, %v381_v6  ;;  %v2849_v11 = vld [vmem:[%s3318_s1 + $0x18] sm:$0xff] (!%p2129_p5)  ;;  %v2854_v12 = vld [vmem:[%s3318_s1 + $0x8] sm:$0xff] (!%p2129_p5) }
  0x19   : > { %s2700_s22 = smov (!%p2129_p5), 113   ;;  %s2701_s23 = smov (!%p2129_p5), 112   ;;  %v2859_v13 = vld [vmem:[%s3318_s1 + $0x10] sm:$0xff] (!%p2129_p5) }
  0x1a   : > { %s2703_s24 = smov (!%p2129_p5), 111   ;;  %v390_v10 = vsub.s32 (!%p2129_p5), 0, %v2836_v7  ;;  %v427_v16 = vsub.s32 (!%p2129_p5), 1, %v2836_v7  ;;  %vm383_vm1 = vcmp.lt.s32.totalorder (!%p2129_p5), %v2838_v8, 17  ;;  %vm420_vm2 = vcmp.lt.s32.totalorder (!%p2129_p5), %v2838_v8, 16 }
  0x1b   : > { %379 = vrot.lane.b32.xlu1 (!%p2129_p5), %v2797_v3, %s2695_s15  ;;  %375 = vrot.lane.b32.xlu0 (!%p2129_p5), %v2804_v4, %s2695_s15  ;;  %v464_v35 = vsub.s32 (!%p2129_p5), 2, %v2836_v7  ;;  %vm457_vm3 = vcmp.lt.s32.totalorder (!%p2129_p5), %v2838_v8, 15  ;;  %v501_v60 = vsub.s32 (!%p2129_p5), 3, %v2836_v7  ;;  %vm494_vm4 = vcmp.lt.s32.totalorder (!%p2129_p5), %v2838_v8, 1 }
  0x1c   : > { %v391_v17 = vrot.slane (!%p2129_p5), %v2843_v9, %v390_v10  ;;  %v403_v18 = vrot.slane (!%p2129_p5), %v2849_v11, %v390_v10  ;;  %v395_v19 = vrot.slane (!%p2129_p5), %v2854_v12, %v390_v10  ;;  %v399_v20 = vrot.slane (!%p2129_p5), %v2859_v13, %v390_v10 }
  0x1d   : > { %v432_v23 = vrot.slane (!%p2129_p5), %v2854_v12, %v427_v16  ;;  %v428_v37 = vrot.slane (!%p2129_p5), %v2843_v9, %v427_v16  ;;  %v436_v38 = vrot.slane (!%p2129_p5), %v2859_v13, %v427_v16  ;;  %v440_v39 = vrot.slane (!%p2129_p5), %v2849_v11, %v427_v16 }
  0x1e   : > { %v469_v49 = vrot.slane %v2854_v12, %v464_v35  ;;  %v465_v56 = vrot.slane %v2843_v9, %v464_v35  ;;  %v473_v58 = vrot.slane %v2859_v13, %v464_v35  ;;  %v477_v59 = vrot.slane %v2849_v11, %v464_v35 }
  0x1f   : > { %414 = vrot.lane.b32.xlu1 %v2804_v4, %s2696_s18  ;;  %412 = vrot.lane.b32.xlu0 %v2792_v2, %s2696_s18  ;;  %vm535_vm5 = vcmp.lt.s32.totalorder %v2838_v8, 127  ;;  %vm572_vm6 = vcmp.lt.s32.totalorder %v2838_v8, 113  ;;  %vm609_vm7 = vcmp.lt.s32.totalorder %v2838_v8, 112  ;;  %vm646_vm8 = vcmp.lt.s32.totalorder %v2838_v8, 111 }
  0x23   : > { %418 = vrot.lane.b32.xlu1 %v2797_v3, %s2696_s18  ;;  %416 = vrot.lane.b32.xlu0 %v2787_v1, %s2696_s18 }
  0x27   : > { %451 = vrot.lane.b32.xlu1 %v2804_v4, %s2697_s19  ;;  %449 = vrot.lane.b32.xlu0 %v2792_v2, %s2697_s19 }
  0x2b   : > { %455 = vrot.lane.b32.xlu1 %v2797_v3, %s2697_s19  ;;  %453 = vrot.lane.b32.xlu0 %v2787_v1, %s2697_s19 }
  0x2f   : > { %488 = vrot.lane.b32.xlu1 %v2804_v4, %s2698_s20  ;;  %486 = vrot.lane.b32.xlu0 %v2792_v2, %s2698_s20 }
  0x33   : > { %492 = vrot.lane.b32.xlu1 %v2797_v3, %s2698_s20  ;;  %490 = vrot.lane.b32.xlu0 %v2787_v1, %s2698_s20 }
  0x37   : > { %529 = vrot.lane.b32.xlu1 %v2804_v4, %s2699_s21  ;;  %527 = vrot.lane.b32.xlu0 %v2792_v2, %s2699_s21 }
  0x3b   : > { %533 = vrot.lane.b32.xlu1 %v2797_v3, %s2699_s21  ;;  %531 = vrot.lane.b32.xlu0 %v2787_v1, %s2699_s21 }
  0x3f   : > { %566 = vrot.lane.b32.xlu1 %v2804_v4, %s2700_s22  ;;  %564 = vrot.lane.b32.xlu0 %v2792_v2, %s2700_s22 }
  0x43   : > { %570 = vrot.lane.b32.xlu1 %v2797_v3, %s2700_s22  ;;  %568 = vrot.lane.b32.xlu0 %v2787_v1, %s2700_s22 }
  0x47   : > { %603 = vrot.lane.b32.xlu1 %v2804_v4, %s2701_s23  ;;  %601 = vrot.lane.b32.xlu0 %v2792_v2, %s2701_s23 }
  0x4b   : > { %607 = vrot.lane.b32.xlu1 %v2797_v3, %s2701_s23  ;;  %605 = vrot.lane.b32.xlu0 %v2787_v1, %s2701_s23 }
  0x4f   : > { %640 = vrot.lane.b32.xlu1 %v2804_v4, %s2703_s24  ;;  %638 = vrot.lane.b32.xlu0 %v2792_v2, %s2703_s24 }
  0x53   : > { %644 = vrot.lane.b32.xlu1 %v2797_v3, %s2703_s24  ;;  %642 = vrot.lane.b32.xlu0 %v2787_v1, %s2703_s24 }
  0x89   : > { %v378_v14 = vpop.permute.xlu1 %377  ;;  %v374_v15 = vpop.permute.xlu0 %373 }
  0x8d   : > { %v380_v21 = vpop.permute.xlu1 %379  ;;  %v376_v22 = vpop.permute.xlu0 %375 }
  0x8e   : > { %v384_v24 = vsel %vm383_vm1, %v378_v14, %v380_v21  ;;  %v387_v25 = vsel %vm383_vm1, %v380_v21, %v374_v15  ;;  %v385_v26 = vsel %vm383_vm1, %v376_v22, %v378_v14  ;;  %v386_v27 = vsel %vm383_vm1, %v374_v15, %v376_v22 }
  0x8f   : > { %v404_v28 = vmul.f32 %v391_v17, %v387_v25  ;;  %v407_v29 = vmul.f32 %v403_v18, %v384_v24  ;;  %v405_v30 = vmul.f32 %v395_v19, %v386_v27  ;;  %v406_v31 = vmul.f32 %v399_v20, %v385_v26 }
  0x90   : > { %v506_v15 = vrot.slane %v2854_v12, %v501_v60  ;;  %v502_v19 = vrot.slane %v2843_v9, %v501_v60  ;;  %v510_v21 = vrot.slane %v2859_v13, %v501_v60  ;;  %v514_v22 = vrot.slane %v2849_v11, %v501_v60 }
  0x91   : > { %v415_v32 = vpop.permute.xlu1 %414  ;;  %v413_v33 = vpop.permute.xlu0 %412 }
  0x92   : > { %v423_v34 = vsel %vm420_vm2, %v413_v33, %v415_v32 }
  0x93   : > { %v442_v36 = vmul.f32 %v432_v23, %v423_v34  ;;  %v542_v23 = vsub.s32 4, %v2836_v7 }
  0x95   : > { %v419_v40 = vpop.permute.xlu1 %418  ;;  %v417_v41 = vpop.permute.xlu0 %416  ;;  %v2425_v42 = vpack.c.bf16 %v442_v36, %v405_v30 }
  0x96   : > { %v424_v43 = vsel %vm420_vm2, %v419_v40, %v413_v33  ;;  %v421_v44 = vsel %vm420_vm2, %v417_v41, %v419_v40  ;;  %v422_v45 = vsel %vm420_vm2, %v415_v32, %v417_v41  ;;  %v543_v33 = vrot.slane %v2843_v9, %v542_v23 }
  0x97   : > { %v441_v46 = vmul.f32 %v428_v37, %v424_v43  ;;  %v443_v47 = vmul.f32 %v436_v38, %v422_v45  ;;  %v444_v48 = vmul.f32 %v440_v39, %v421_v44  ;;  %2426 = vmatprep.subr.bf16.mxu0 %v2425_v42  ;;  %v555_v40 = vrot.slane %v2849_v11, %v542_v23 }
  0x98   : > { %v547_v42 = vrot.slane %v2854_v12, %v542_v23  ;;  %v551_v43 = vrot.slane %v2859_v13, %v542_v23  ;;  %v579_v44 = vsub.s32 5, %v2836_v7 }
  0x99   : > { %v452_v50 = vpop.permute.xlu1 %451  ;;  %v450_v51 = vpop.permute.xlu0 %449  ;;  %v2427_v52 = vpack.c.bf16 %v441_v46, %v404_v28  ;;  %v2441_v53 = vpack.c.bf16 %v444_v48, %v407_v29  ;;  %v2443_v54 = vpack.c.bf16 %v443_v47, %v406_v31 }
  0x9a   : > { %v460_v55 = vsel %vm457_vm3, %v450_v51, %v452_v50  ;;  %v592_v60 = vrot.slane %v2849_v11, %v579_v44 }
  0x9b   : > { %v479_v57 = vmul.f32 %v469_v49, %v460_v55  ;;  %2428 = vmatpush1.bf16.msra.mxu0 %v2427_v52  ;;  %2442 = vmatprep.subr.bf16.mxu1 %v2441_v53  ;;  %v580_v53 = vrot.slane %v2843_v9, %v579_v44 }
  0x9c   : > { %2444 = vmatpush1.bf16.msra.mxu1 %v2443_v54 }
  0x9d   : > { %v456_v61 = vpop.permute.xlu1 %455  ;;  %v454_v62 = vpop.permute.xlu0 %453 }
  0x9e   : > { %v461_v63 = vsel %vm457_vm3, %v456_v61, %v450_v51  ;;  %v458_v0 = vsel %vm457_vm3, %v454_v62, %v456_v61  ;;  %v459_v5 = vsel %vm457_vm3, %v452_v50, %v454_v62 }
  0x9f   : > { %v478_v6 = vmul.f32 %v465_v56, %v461_v63  ;;  %v480_v10 = vmul.f32 %v473_v58, %v459_v5  ;;  %v481_v14 = vmul.f32 %v477_v59, %v458_v0  ;;  %v584_v63 = vrot.slane %v2854_v12, %v579_v44 }
  0xa0   : > { %v588_v0 = vrot.slane %v2859_v13, %v579_v44  ;;  %v616_v5 = vsub.s32 6, %v2836_v7 }
  0xa1   : > { %v489_v16 = vpop.permute.xlu1 %488  ;;  %v487_v17 = vpop.permute.xlu0 %486 }
  0xa2   : > { %v497_v18 = vsel %vm494_vm4, %v487_v17, %v489_v16  ;;  %v625_v23 = vrot.slane %v2859_v13, %v616_v5 }
  0xa3   : > { %v516_v20 = vmul.f32 %v506_v15, %v497_v18 }
  0xa5   : > { %v493_v24 = vpop.permute.xlu1 %492  ;;  %v491_v25 = vpop.permute.xlu0 %490  ;;  %v2429_v26 = vpack.c.bf16 %v516_v20, %v479_v57  ;;  %v629_v20 = vrot.slane %v2849_v11, %v616_v5 }
  0xa6   : > { %v498_v27 = vsel %vm494_vm4, %v493_v24, %v487_v17  ;;  %v495_v28 = vsel %vm494_vm4, %v491_v25, %v493_v24  ;;  %v496_v29 = vsel %vm494_vm4, %v489_v16, %v491_v25  ;;  %v617_v16 = vrot.slane %v2843_v9, %v616_v5 }
  0xa7   : > { %v515_v30 = vmul.f32 %v502_v19, %v498_v27  ;;  %v517_v31 = vmul.f32 %v510_v21, %v496_v29  ;;  %v518_v32 = vmul.f32 %v514_v22, %v495_v28  ;;  %2430 = vmatprep.subr.bf16.mxu0 %v2429_v26  ;;  %v621_v22 = vrot.slane %v2854_v12, %v616_v5 }
  0xa8   : > { %v653_v24 = vsub.s32 7, %v2836_v7 }
  0xa9   : > { %v530_v34 = vpop.permute.xlu1 %529  ;;  %v528_v35 = vpop.permute.xlu0 %527  ;;  %v2431_v36 = vpack.c.bf16 %v515_v30, %v478_v6  ;;  %v2445_v37 = vpack.c.bf16 %v518_v32, %v481_v14  ;;  %v2447_v38 = vpack.c.bf16 %v517_v31, %v480_v10 }
  0xaa   : > { %v538_v39 = vsel %vm535_vm5, %v528_v35, %v530_v34 }
  0xab   : > { %v556_v41 = vmul.f32 %v543_v33, %v538_v39  ;;  %2432 = vmatpush1.bf16.msra.mxu0 %v2431_v36  ;;  %2446 = vmatprep.subr.bf16.mxu1 %v2445_v37  ;;  %v654_v33 = vrot.slane %v2843_v9, %v653_v24  ;;  %v666_v39 = vrot.slane %v2849_v11, %v653_v24 }
  0xac   : > { %2448 = vmatpush1.bf16.msra.mxu1 %v2447_v38 }
  0xad   : > { %v534_v45 = vpop.permute.xlu1 %533  ;;  %v532_v46 = vpop.permute.xlu0 %531  ;;  %v2435_v61 = vpack.c.bf16 %v556_v41, %v2792_v2 }
  0xae   : > { %v539_v47 = vsel %vm535_vm5, %v534_v45, %v528_v35  ;;  %v536_v48 = vsel %vm535_vm5, %v532_v46, %v534_v45  ;;  %v537_v49 = vsel %vm535_vm5, %v530_v34, %v532_v46 }
  0xaf   : > { %v559_v50 = vmul.f32 %v555_v40, %v539_v47  ;;  %v557_v51 = vmul.f32 %v547_v42, %v537_v49  ;;  %v558_v52 = vmul.f32 %v551_v43, %v536_v48  ;;  %v658_v42 = vrot.slane %v2854_v12, %v653_v24 }
  0xb0   : > { %v662_v43 = vrot.slane %v2859_v13, %v653_v24  ;;  %v675_v13 = vld [vmem:[%s3319_s2] sm:$0xff]  ;;  %v2704_v49 = vmov 1.0|1.0  }
  0xb1   : > { %v567_v54 = vpop.permute.xlu1 %566  ;;  %v565_v55 = vpop.permute.xlu0 %564  ;;  %v2433_v56 = vpack.c.bf16 %v557_v51, %v2804_v4  ;;  %v2449_v57 = vpack.c.bf16 %v559_v50, %v2797_v3  ;;  %v2451_v58 = vpack.c.bf16 %v558_v52, %v2787_v1 }
  0xb2   : > { %v575_v59 = vsel %vm572_vm6, %v565_v55, %v567_v54 }
  0xb3   : > { %v593_v62 = vmul.f32 %v580_v53, %v575_v59  ;;  %2434 = vmatprep.subr.bf16.mxu0 %v2433_v56  ;;  %2450 = vmatprep.subr.bf16.mxu1 %v2449_v57 }
  0xb4   : > { %2436 = vmatpush1.bf16.msra.mxu0 %v2435_v61  ;;  %2452 = vmatpush1.bf16.msra.mxu1 %v2451_v58 }
  0xb5   : > { %v571_v3 = vpop.permute.xlu1 %570  ;;  %v569_v1 = vpop.permute.xlu0 %568 }
  0xb6   : > { %v576_v4 = vsel %vm572_vm6, %v571_v3, %v565_v55  ;;  %v573_v6 = vsel %vm572_vm6, %v569_v1, %v571_v3  ;;  %v574_v2 = vsel %vm572_vm6, %v567_v54, %v569_v1 }
  0xb7   : > { %v596_v10 = vmul.f32 %v592_v60, %v576_v4  ;;  %v594_v14 = vmul.f32 %v584_v63, %v574_v2  ;;  %v595_v15 = vmul.f32 %v588_v0, %v573_v6  ;;  %v865_v63 = vld [vmem:[#allocation5] sm:$0xff] }
  0xb9   : > { %v604_v17 = vpop.permute.xlu1 %603  ;;  %v602_v18 = vpop.permute.xlu0 %601 }
  0xba   : > { %v612_v19 = vsel %vm609_vm7, %v602_v18, %v604_v17 }
  0xbb   : > { %v630_v21 = vmul.f32 %v617_v16, %v612_v19 }
  0xbd   : > { %v608_v25 = vpop.permute.xlu1 %607  ;;  %v606_v26 = vpop.permute.xlu0 %605  ;;  %v2439_v40 = vpack.c.bf16 %v630_v21, %v593_v62 }
  0xbe   : > { %v613_v27 = vsel %vm609_vm7, %v608_v25, %v602_v18  ;;  %v610_v28 = vsel %vm609_vm7, %v606_v26, %v608_v25  ;;  %v611_v29 = vsel %vm609_vm7, %v604_v17, %v606_v26 }
  0xbf   : > { %v633_v30 = vmul.f32 %v629_v20, %v613_v27  ;;  %v631_v31 = vmul.f32 %v621_v22, %v611_v29  ;;  %v632_v32 = vmul.f32 %v625_v23, %v610_v28 }
  0xc1   : > { %v641_v34 = vpop.permute.xlu1 %640  ;;  %v639_v7 = vpop.permute.xlu0 %638  ;;  %v2437_v35 = vpack.c.bf16 %v631_v31, %v594_v14  ;;  %v2453_v36 = vpack.c.bf16 %v633_v30, %v596_v10  ;;  %v2455_v37 = vpack.c.bf16 %v632_v32, %v595_v15  ;;  %v1009_v14 = vld [vmem:[#allocation6] sm:$0xff] }
  0xc2   : > { %v649_v38 = vsel %vm646_vm8, %v639_v7, %v641_v34 }
  0xc3   : > { %v667_v41 = vmul.f32 %v654_v33, %v649_v38  ;;  %2438 = vmatprep.subr.bf16.mxu0 %v2437_v35  ;;  %2454 = vmatprep.subr.bf16.mxu1 %v2453_v36 }
  0xc4   : > { %2440 = vmatpush1.bf16.msra.mxu0 %v2439_v40  ;;  %2456 = vmatpush1.bf16.msra.mxu1 %v2455_v37 }
  0xc5   : > { %v645_v9 = vpop.permute.xlu1 %644  ;;  %v643_v44 = vpop.permute.xlu0 %642 }
  0xc6   : > { %v650_v45 = vsel %vm646_vm8, %v645_v9, %v639_v7  ;;  %v647_v46 = vsel %vm646_vm8, %v643_v44, %v645_v9  ;;  %v648_v11 = vsel %vm646_vm8, %v641_v34, %v643_v44 }
  0xc7   : > { %v670_v47 = vmul.f32 %v666_v39, %v650_v45  ;;  %v668_v48 = vmul.f32 %v658_v42, %v648_v11  ;;  %v669_v12 = vmul.f32 %v662_v43, %v647_v46 }
  0xc9   : > { %732 = vmatprep.subr.mxu0 %v668_v48  ;;  %803 = vmatprep.subr.mxu1 %v670_v47 }
  0xca   : > { %733 = vmatpush1.msra.mxu0 %v667_v41  ;;  %804 = vmatpush1.msra.mxu1 %v669_v12 }
  0xcb   : > { %2132 = vmatmul.mubr.msk.f32.vlgmr.msra.gmra.mrb[0].mxu0 %vm712_vm9, %v675_v13  ;;  %2133 = vmatmul.mubr.msk.f32.vlgmr.msra.gmra.mrb[0].mxu1 %vm712_vm9, %v675_v13 }
  0xcc   : > { %2457 = vmatprep.subr.bf16.mxu0 %v2704_v49  ;;  %2473 = vmatprep.subr.bf16.mxu1 %v2704_v49 }
  0xcd   : > { %2458 = vmatpush3.bf16.msra.mxu0 %v2704_v49  ;;  %2474 = vmatpush3.bf16.msra.mxu1 %v2704_v49 }
  0xce   : > { %2459 = vmatprep.subr.bf16.mxu0 %v2704_v49  ;;  %2475 = vmatprep.subr.bf16.mxu1 %v2704_v49 }
  0xd1   : > { %2460 = vmatpush3.bf16.msra.mxu0 %v2704_v49  ;;  %2476 = vmatpush3.bf16.msra.mxu1 %v2704_v49 }
  0xd2   : > { %2461 = vmatprep.subr.bf16.mxu0 %v2704_v49  ;;  %2477 = vmatprep.subr.bf16.mxu1 %v2704_v49 }
  0xd5   : > { %2462 = vmatpush3.bf16.msra.mxu0 %v2704_v49  ;;  %2478 = vmatpush3.bf16.msra.mxu1 %v2704_v49 }
  0xd6   : > { %2463 = vmatprep.subr.bf16.mxu0 %v2704_v49  ;;  %2479 = vmatprep.subr.bf16.mxu1 %v2704_v49 }
  0xd9   : > { %2464 = vmatpush3.bf16.msra.mxu0 %v2704_v49  ;;  %2480 = vmatpush3.bf16.msra.mxu1 %v2704_v49 }
  0xda   : > { %2465 = vmatprep.subr.bf16.mxu0 %v2704_v49  ;;  %2481 = vmatprep.subr.bf16.mxu1 %v2704_v49 }
  0xdd   : > { %2466 = vmatpush3.bf16.msra.mxu0 %v2704_v49  ;;  %2482 = vmatpush3.bf16.msra.mxu1 %v2704_v49 }
  0xde   : > { %2467 = vmatprep.subr.bf16.mxu0 %v2704_v49  ;;  %2483 = vmatprep.subr.bf16.mxu1 %v2704_v49 }
  0xe1   : > { %2468 = vmatpush3.bf16.msra.mxu0 %v2704_v49  ;;  %2484 = vmatpush3.bf16.msra.mxu1 %v2704_v49 }
  0xe2   : > { %2469 = vmatprep.subr.bf16.mxu0 %v2704_v49  ;;  %2485 = vmatprep.subr.bf16.mxu1 %v2704_v49 }
  0xe5   : > { %2470 = vmatpush3.bf16.msra.mxu0 %v2704_v49  ;;  %2486 = vmatpush3.bf16.msra.mxu1 %v2704_v49 }
  0xe6   : > { %2471 = vmatprep.subr.bf16.mxu0 %v2704_v49  ;;  %2487 = vmatprep.subr.bf16.mxu1 %v2704_v49 }
  0xe9   : > { %2472 = vmatpush3.bf16.msra.mxu0 %v2704_v49  ;;  %2488 = vmatpush3.bf16.msra.mxu1 %v2704_v49 }
  0xea   : > { %2489 = vmatprep.subr.bf16.mxu0 %v2704_v49  ;;  %2505 = vmatprep.subr.bf16.mxu1 %v2704_v49 }
 0x19e   : > { %v782_v8 = vpop.f32.mrb[0].mxu0  ;;  %v853_v50 = vpop.f32.mrb[0].mxu1 }
 0x19f   : > { %861 = vst [vmem:[#allocation2] sm:$0xff] %v782_v8  ;;  %863 = vst [vmem:[#allocation2 + $0x10] sm:$0xff] %v853_v50  ;;  %v784_v51 = vpop.f32.mrb[1].mxu0  ;;  %v855_v52 = vpop.f32.mrb[1].mxu1  ;;  %v1010_v55 = vmul.f32 %v782_v8, %v782_v8  ;;  %v1012_v56 = vmul.f32 %v853_v50, %v853_v50 }
 0x1a0   : > { %862 = vst [vmem:[#allocation2 + $0x8] sm:$0xff] %v784_v51  ;;  %v1011_v53 = vmul.f32 %v784_v51, %v784_v51  ;;  %864 = vst [vmem:[#allocation2 + $0x18] sm:$0xff] %v855_v52  ;;  %v1013_v54 = vmul.f32 %v855_v52, %v855_v52  ;;  %930 = vmatprep.mubr.f32.mxu0 %v784_v51  ;;  %1000 = vmatprep.mubr.f32.mxu1 %v855_v52 }
 0x1a1   : > { %931 = vmatmul.mubr.f32.vlgmr.msra.gmra.mrb[2].mxu0 %v782_v8  ;;  %1001 = vmatmul.mubr.f32.vlgmr.msra.gmra.mrb[2].mxu1 %v853_v50 }
 0x1a2   : > { %2490 = vmatpush3.bf16.msra.mxu0 %v2704_v49  ;;  %2506 = vmatpush3.bf16.msra.mxu1 %v2704_v49 }
 0x1a3   : > { %1078 = vmatprep.mubr.f32.mxu0 %v1011_v53  ;;  %1148 = vmatprep.mubr.f32.mxu1 %v1013_v54 }
 0x1a4   : > { %2491 = vmatprep.subr.bf16.mxu0 %v2704_v49  ;;  %2507 = vmatprep.subr.bf16.mxu1 %v2704_v49 }
 0x1a6   : > { %2492 = vmatpush3.bf16.msra.mxu0 %v2704_v49  ;;  %2508 = vmatpush3.bf16.msra.mxu1 %v2704_v49 }
 0x1a7   : > { %2493 = vmatprep.subr.bf16.mxu0 %v2704_v49  ;;  %2509 = vmatprep.subr.bf16.mxu1 %v2704_v49 }
 0x1aa   : > { %2494 = vmatpush3.bf16.msra.mxu0 %v2704_v49  ;;  %2510 = vmatpush3.bf16.msra.mxu1 %v2704_v49 }
 0x1ab   : > { %2495 = vmatprep.subr.bf16.mxu0 %v2704_v49  ;;  %2511 = vmatprep.subr.bf16.mxu1 %v2704_v49 }
 0x1ae   : > { %2496 = vmatpush3.bf16.msra.mxu0 %v2704_v49  ;;  %2512 = vmatpush3.bf16.msra.mxu1 %v2704_v49 }
 0x1af   : > { %2497 = vmatprep.subr.bf16.mxu0 %v2704_v49  ;;  %2513 = vmatprep.subr.bf16.mxu1 %v2704_v49 }
 0x1b2   : > { %2498 = vmatpush3.bf16.msra.mxu0 %v2704_v49  ;;  %2514 = vmatpush3.bf16.msra.mxu1 %v2704_v49 }
 0x1b3   : > { %2499 = vmatprep.subr.bf16.mxu0 %v2704_v49  ;;  %2515 = vmatprep.subr.bf16.mxu1 %v2704_v49 }
 0x1b6   : > { %2500 = vmatpush3.bf16.msra.mxu0 %v2704_v49  ;;  %2516 = vmatpush3.bf16.msra.mxu1 %v2704_v49 }
 0x1b7   : > { %2501 = vmatprep.subr.bf16.mxu0 %v2704_v49  ;;  %2517 = vmatprep.subr.bf16.mxu1 %v2704_v49 }
 0x1ba   : > { %2502 = vmatpush3.bf16.msra.mxu0 %v2704_v49  ;;  %2518 = vmatpush3.bf16.msra.mxu1 %v2704_v49 }
 0x1bb   : > { %2503 = vmatprep.subr.bf16.mxu0 %v2704_v49  ;;  %2519 = vmatprep.subr.bf16.mxu1 %v2704_v49 }
 0x1be   : > { %2504 = vmatpush3.bf16.msra.mxu0 %v2704_v49  ;;  %2520 = vmatpush3.bf16.msra.mxu1 %v2704_v49 }
 0x1c1   : > { %1079 = vmatmul.mubr.f32.vlgmr.msra.gmra.mrb[4].mxu0 %v1010_v55  ;;  %1149 = vmatmul.mubr.f32.vlgmr.msra.gmra.mrb[4].mxu1 %v1012_v56 }
 0x274   : > { %v2177_v57 = vpop.f32.mrb[2].mxu0  ;;  %v2212_v58 = vpop.f32.mrb[2].mxu1 }
 0x275   : > { %v2178_v59 = vpop.f32.mrb[3].mxu0  ;;  %v2213_v60 = vpop.f32.mrb[3].mxu1 }
 0x276   : > { %v2179_v61 = vadd.f32 %v2178_v59, %v2177_v57  ;;  %v2214_v62 = vadd.f32 %v2213_v60, %v2212_v58 }
 0x278   : > { %v1003_v0 = vadd.f32 %v2214_v62, %v2179_v61 }
 0x27a   : > { %v1006_v5 = vadd.f32 %v1003_v0, %v865_v63 }
 0x27c   : > { %1008 = vst.msk [vmem:[#allocation5] sm:$0xff] %vm1007_vm10, %v1006_v5 }
 0x294   : > { %v2247_v3 = vpop.f32.mrb[4].mxu0  ;;  %v2282_v1 = vpop.f32.mrb[4].mxu1 }
 0x295   : > { %v2248_v4 = vpop.f32.mrb[5].mxu0  ;;  %v2283_v6 = vpop.f32.mrb[5].mxu1 }
 0x296   : > { %v2249_v2 = vadd.f32 %v2248_v4, %v2247_v3  ;;  %v2284_v10 = vadd.f32 %v2283_v6, %v2282_v1 }
 0x298   : > { %v1151_v15 = vadd.f32 %v2284_v10, %v2249_v2 }
 0x29a   : > { %v1154_v16 = vadd.f32 %v1151_v15, %v1009_v14 }
 0x29c   : > { %1155 = vst.msk [vmem:[#allocation6] sm:$0xff] %vm1007_vm10, %v1154_v16 }
 0x29d PF: > { %p2134_p6 = scmp.ne.s32.totalorder %s2684_s27, 1 }
 0x29e   : > { %v1160_v17 = vld [vmem:[#allocation5] sm:$0xff] (!%p2134_p6)  ;;  %v2705_v19 = vmov (!%p2134_p6), 0   ;;  %v1178_v33 = vld [vmem:[#allocation2 + $0x8] sm:$0xff] (!%p2134_p6)  ;;  %v1179_v34 = vld [vmem:[#allocation2 + $0x10] sm:$0xff] (!%p2134_p6)  ;;  %s2706_s21 = smov (!%p2134_p6), 17   ;;  %s2707_s22 = smov (!%p2134_p6), 16   ;;  %v1215_v48 = vlaneseq (!%p2134_p6) }
 0x29f   : > { %1159 = sbr.rel (%p2134_p6) target bundleno = 1483 (0x5cb), region = 64  ;;  %2664 = vset.pattern.permute.xlu0 (!%p2134_p6), %v2705_v19  ;;  %v1161_v20 = vmul.f32 (!%p2134_p6), 0.001953125, %v1160_v17  ;;  %v1167_v26 = vld [vmem:[%s3320_s3] sm:$0xff] (!%p2134_p6)  ;;  %v1180_v7 = vld [vmem:[#allocation2 + $0x18] sm:$0xff] (!%p2134_p6)  ;;  %s2708_s23 = smov (!%p2134_p6), 15   ;;  %v2713_v47 = vmov (!%p2134_p6), 0.0  }
 0x2a0   : > { %v1171_v29 = vld [vmem:[%s3321_s4] sm:$0xff] (!%p2134_p6)  ;;  %s2709_s24 = smov (!%p2134_p6), 1   ;;  %s2710_s25 = smov (!%p2134_p6), 127   ;;  %1614 = vmatprep.mubr.f32.mxu0 (!%p2134_p6), %v2713_v47  ;;  %1685 = vmatprep.mubr.f32.mxu1 (!%p2134_p6), %v2713_v47  ;;  %v3082_v12 = vshrl.u32 (!%p2134_p6), %v1215_v48, 7  ;;  %v3084_v13 = vand.u32 (!%p2134_p6), 127, %v1215_v48  ;;  %v3090_v8 = vld [vmem:[%s3318_s1 + $0x8] sm:$0xff] (!%p2134_p6) }
 0x2a1   : > { %v1164_v22 = vmul.f32 (!%p2134_p6), %v1161_v20, %v1161_v20  ;;  %v1177_v32 = vld [vmem:[#allocation2] sm:$0xff] (!%p2134_p6)  ;;  %s2711_s26 = smov (!%p2134_p6), 113   ;;  %s2712_s9 = smov (!%p2134_p6), 112   ;;  %v3095_v50 = vld [vmem:[%s3318_s1 + $0x10] sm:$0xff] (!%p2134_p6)  ;;  %v3108_v56 = vld [vmem:[%s3318_s1 + $0x18] sm:$0xff] (!%p2134_p6)  ;;  %vm1546_vm3 = vcmask (!%p2134_p6), 588800  }
 0x2a2   : > { %s2714_s10 = smov (!%p2134_p6), 111   ;;  %v1224_v49 = vsub.s32 (!%p2134_p6), 0, %v3082_v12  ;;  %vm1217_vm11 = vcmp.lt.s32.totalorder (!%p2134_p6), %v3084_v13, 17  ;;  %v3103_v55 = vld [vmem:[%s3318_s1] sm:$0xff] (!%p2134_p6)  ;;  %v1261_v5 = vsub.s32 (!%p2134_p6), 1, %v3082_v12  ;;  %vm1254_vm12 = vcmp.lt.s32.totalorder (!%p2134_p6), %v3084_v13, 16 }
 0x2a3   : > { %v1162_v18 = vld [vmem:[#allocation6] sm:$0xff] (!%p2134_p6)  ;;  %vm1291_vm13 = vcmp.lt.s32.totalorder (!%p2134_p6), %v3084_v13, 15  ;;  %vm1328_vm14 = vcmp.lt.s32.totalorder (!%p2134_p6), %v3084_v13, 1  ;;  %vm1369_vm15 = vcmp.lt.s32.totalorder (!%p2134_p6), %v3084_v13, 127  ;;  %vm1406_vm0 = vcmp.lt.s32.totalorder (!%p2134_p6), %v3084_v13, 113 }
 0x2a4   : > { %v1163_v21 = vmul.f32 (!%p2134_p6), 0.001953125, %v1162_v18  ;;  %v1229_v53 = vrot.slane (!%p2134_p6), %v3090_v8, %v1224_v49  ;;  %v1233_v54 = vrot.slane (!%p2134_p6), %v3095_v50, %v1224_v49  ;;  %v1225_v61 = vrot.slane (!%p2134_p6), %v3103_v55, %v1224_v49 }
 0x2a5   : > { %v1237_v0 = vrot.slane (!%p2134_p6), %v3108_v56, %v1224_v49  ;;  %v1266_v14 = vrot.slane (!%p2134_p6), %v3090_v8, %v1261_v5  ;;  %v1270_v15 = vrot.slane (!%p2134_p6), %v3095_v50, %v1261_v5  ;;  %vm1443_vm1 = vcmp.lt.s32.totalorder (!%p2134_p6), %v3084_v13, 112 }
 0x2a6   : > { %v1165_v23 = vsub.f32 %v1163_v21, %v1164_v22  ;;  %vm1480_vm2 = vcmp.lt.s32.totalorder %v3084_v13, 111  ;;  %vm1840_vm4 = vcmask 7168  }
 0x2a8   : > { %v1166_v24 = vmax.f32 %v1165_v23, 0.0  ;;  %v1274_v23 = vrot.slane %v3108_v56, %v1261_v5 }
 0x2aa   : > { %v1168_v25 = vadd.f32 1e-05, %v1166_v24  ;;  %v1298_v24 = vsub.s32 2, %v3082_v12 }
 0x2ac   : > { %2665 = vrsqrt.f32 %v1168_v25 }
 0x2b6   : > { %v2666_v27 = vpop.eup %2665 }
 0x2b7   : > { %v1170_v28 = vmul.f32 %v2666_v27, %v1167_v26 }
 0x2b9   : > { %1183 = vperm.xlu0 %2664, %v1170_v28   ;;  %v1172_v30 = vmul.f32 %v1170_v28, %v1161_v20  ;;  %v1262_v20 = vrot.slane %v3103_v55, %v1261_v5 }
 0x2bb   : > { %v1173_v31 = vsub.f32 %v1171_v29, %v1172_v30 }
 0x2bd   : > { %1192 = vperm.xlu0 %2664, %v1173_v31  }
 0x338   : > { %v1184_v35 = vpop.permute.xlu0 %1183 }
 0x339   : > { %v1186_v36 = vmul.f32 %v1184_v35, %v1177_v32  ;;  %v1187_v37 = vmul.f32 %v1184_v35, %v1178_v33  ;;  %v1188_v38 = vmul.f32 %v1184_v35, %v1179_v34  ;;  %v1189_v39 = vmul.f32 %v1184_v35, %v1180_v7 }
 0x33a   : > { %v1303_v32 = vrot.slane %v3090_v8, %v1298_v24  ;;  %v1307_v33 = vrot.slane %v3095_v50, %v1298_v24 }
 0x33c   : > { %v1193_v40 = vpop.permute.xlu0 %1192 }
 0x33d   : > { %v1195_v41 = vadd.f32 %v1193_v40, %v1186_v36  ;;  %v1196_v42 = vadd.f32 %v1193_v40, %v1187_v37  ;;  %v1197_v43 = vadd.f32 %v1193_v40, %v1188_v38  ;;  %v1198_v9 = vadd.f32 %v1193_v40, %v1189_v39 }
 0x33e   : > { %v1299_v39 = vrot.slane %v3103_v55, %v1298_v24 }
 0x33f   : > { %v3042_v44 = vmax.f32 %v1195_v41, 0.0  ;;  %v3044_v45 = vmax.f32 %v1196_v42, 0.0  ;;  %v3046_v46 = vmax.f32 %v1197_v43, 0.0  ;;  %v3048_v11 = vmax.f32 %v1198_v9, 0.0 }
 0x340   : > { %v1311_v43 = vrot.slane %v3108_v56, %v1298_v24  ;;  %v1335_v9 = vsub.s32 3, %v3082_v12 }
 0x341   : > { %1211 = vrot.lane.b32.xlu0 %v3046_v46, %s2706_s21  ;;  %1207 = vrot.lane.b32.xlu1 %v3042_v44, %s2706_s21 }
 0x342   : > { %v1348_v5 = vrot.slane %v3108_v56, %v1335_v9 }
 0x345   : > { %1246 = vrot.lane.b32.xlu0 %v3042_v44, %s2707_s22  ;;  %1209 = vrot.lane.b32.xlu1 %v3044_v45, %s2706_s21 }
 0x349   : > { %1250 = vrot.lane.b32.xlu0 %v3046_v46, %s2707_s22  ;;  %1213 = vrot.lane.b32.xlu1 %v3048_v11, %s2706_s21 }
 0x34d   : > { %1283 = vrot.lane.b32.xlu0 %v3042_v44, %s2708_s23  ;;  %1248 = vrot.lane.b32.xlu1 %v3044_v45, %s2707_s22 }
 0x351   : > { %1287 = vrot.lane.b32.xlu0 %v3046_v46, %s2708_s23  ;;  %1252 = vrot.lane.b32.xlu1 %v3048_v11, %s2707_s22 }
 0x355   : > { %1320 = vrot.lane.b32.xlu0 %v3042_v44, %s2709_s24  ;;  %1285 = vrot.lane.b32.xlu1 %v3044_v45, %s2708_s23 }
 0x359   : > { %1324 = vrot.lane.b32.xlu0 %v3046_v46, %s2709_s24  ;;  %1289 = vrot.lane.b32.xlu1 %v3048_v11, %s2708_s23 }
 0x35d   : > { %1361 = vrot.lane.b32.xlu0 %v3042_v44, %s2710_s25  ;;  %1322 = vrot.lane.b32.xlu1 %v3044_v45, %s2709_s24 }
 0x361   : > { %1365 = vrot.lane.b32.xlu0 %v3046_v46, %s2710_s25  ;;  %1326 = vrot.lane.b32.xlu1 %v3048_v11, %s2709_s24 }
 0x365   : > { %1398 = vrot.lane.b32.xlu0 %v3042_v44, %s2711_s26  ;;  %1363 = vrot.lane.b32.xlu1 %v3044_v45, %s2710_s25 }
 0x369   : > { %1402 = vrot.lane.b32.xlu0 %v3046_v46, %s2711_s26  ;;  %1367 = vrot.lane.b32.xlu1 %v3048_v11, %s2710_s25 }
 0x36d   : > { %1435 = vrot.lane.b32.xlu0 %v3042_v44, %s2712_s9  ;;  %1400 = vrot.lane.b32.xlu1 %v3044_v45, %s2711_s26 }
 0x371   : > { %1439 = vrot.lane.b32.xlu0 %v3046_v46, %s2712_s9  ;;  %1404 = vrot.lane.b32.xlu1 %v3048_v11, %s2711_s26 }
 0x375   : > { %1472 = vrot.lane.b32.xlu0 %v3042_v44, %s2714_s10  ;;  %1437 = vrot.lane.b32.xlu1 %v3044_v45, %s2712_s9 }
 0x379   : > { %1476 = vrot.lane.b32.xlu0 %v3046_v46, %s2714_s10  ;;  %1441 = vrot.lane.b32.xlu1 %v3048_v11, %s2712_s9 }
 0x37d   : > { %1474 = vrot.lane.b32.xlu1 %v3044_v45, %s2714_s10 }
 0x381   : > { %1478 = vrot.lane.b32.xlu1 %v3048_v11, %s2714_s10 }
 0x3b3   : > { %v1212_v51 = vpop.permute.xlu0 %1211  ;;  %v1208_v52 = vpop.permute.xlu1 %1207 }
 0x3b7   : > { %v1247_v57 = vpop.permute.xlu0 %1246  ;;  %v1210_v58 = vpop.permute.xlu1 %1209 }
 0x3b8   : > { %v1219_v59 = vsel %vm1217_vm11, %v1210_v58, %v1212_v51  ;;  %v1220_v60 = vsel %vm1217_vm11, %v1208_v52, %v1210_v58 }
 0x3b9   : > { %v1239_v62 = vmul.f32 %v1229_v53, %v1220_v60  ;;  %v1240_v63 = vmul.f32 %v1233_v54, %v1219_v59  ;;  %v1340_v54 = vrot.slane %v3090_v8, %v1335_v9 }
 0x3bb   : > { %v1251_v3 = vpop.permute.xlu0 %1250  ;;  %v1214_v1 = vpop.permute.xlu1 %1213 }
 0x3bc   : > { %v1218_v4 = vsel %vm1217_vm11, %v1212_v51, %v1214_v1  ;;  %v1221_v6 = vsel %vm1217_vm11, %v1214_v1, %v1208_v52 }
 0x3bd   : > { %v1238_v2 = vmul.f32 %v1225_v61, %v1221_v6  ;;  %v1241_v10 = vmul.f32 %v1237_v0, %v1218_v4 }
 0x3bf   : > { %v1284_v16 = vpop.permute.xlu0 %1283  ;;  %v1249_v17 = vpop.permute.xlu1 %1248 }
 0x3c0   : > { %v1256_v18 = vsel %vm1254_vm12, %v1249_v17, %v1251_v3  ;;  %v1257_v19 = vsel %vm1254_vm12, %v1247_v57, %v1249_v17 }
 0x3c1   : > { %v1276_v21 = vmul.f32 %v1266_v14, %v1257_v19  ;;  %v1277_v22 = vmul.f32 %v1270_v15, %v1256_v18 }
 0x3c3   : > { %v1288_v25 = vpop.permute.xlu0 %1287  ;;  %v1253_v26 = vpop.permute.xlu1 %1252  ;;  %v2521_v27 = vpack.c.bf16 %v1276_v21, %v1239_v62  ;;  %v2539_v40 = vpack.c.bf16 %v1277_v22, %v1240_v63  ;;  %v1336_v62 = vrot.slane %v3103_v55, %v1335_v9 }
 0x3c4   : > { %v1255_v28 = vsel %vm1254_vm12, %v1251_v3, %v1253_v26  ;;  %v1258_v29 = vsel %vm1254_vm12, %v1253_v26, %v1247_v57  ;;  %v1344_v57 = vrot.slane %v3095_v50, %v1335_v9  ;;  %v1376_v3 = vsub.s32 4, %v3082_v12 }
 0x3c5   : > { %v1275_v30 = vmul.f32 %v1262_v20, %v1258_v29  ;;  %v1278_v31 = vmul.f32 %v1274_v23, %v1255_v28  ;;  %2522 = vmatprep.subr.bf16.mxu0 %v2521_v27  ;;  %v1413_v29 = vsub.s32 5, %v3082_v12 }
 0x3c6   : > { %v1381_v17 = vrot.slane %v3090_v8, %v1376_v3  ;;  %v1385_v24 = vrot.slane %v3095_v50, %v1376_v3  ;;  %v1389_v28 = vrot.slane %v3108_v56, %v1376_v3 }
 0x3c7   : > { %v1321_v34 = vpop.permute.xlu0 %1320  ;;  %v1286_v7 = vpop.permute.xlu1 %1285  ;;  %v2523_v35 = vpack.c.bf16 %v1275_v30, %v1238_v2  ;;  %v2537_v36 = vpack.c.bf16 %v1278_v31, %v1241_v10 }
 0x3c8   : > { %v1293_v37 = vsel %vm1291_vm13, %v1286_v7, %v1288_v25  ;;  %v1294_v38 = vsel %vm1291_vm13, %v1284_v16, %v1286_v7 }
 0x3c9   : > { %v1313_v41 = vmul.f32 %v1303_v32, %v1294_v38  ;;  %v1314_v42 = vmul.f32 %v1307_v33, %v1293_v37  ;;  %2524 = vmatpush1.bf16.msra.mxu0 %v2523_v35  ;;  %2538 = vmatprep.subr.bf16.mxu1 %v2537_v36  ;;  %v1414_v37 = vrot.slane %v3103_v55, %v1413_v29 }
 0x3ca   : > { %2540 = vmatpush1.bf16.msra.mxu1 %v2539_v40  ;;  %v1418_v38 = vrot.slane %v3090_v8, %v1413_v29 }
 0x3cb   : > { %v1325_v47 = vpop.permute.xlu0 %1324  ;;  %v1290_v48 = vpop.permute.xlu1 %1289 }
 0x3cc   : > { %v1292_v49 = vsel %vm1291_vm13, %v1288_v25, %v1290_v48  ;;  %v1295_v51 = vsel %vm1291_vm13, %v1290_v48, %v1284_v16  ;;  %v1377_v16 = vrot.slane %v3103_v55, %v1376_v3  ;;  %v1426_v48 = vrot.slane %v3108_v56, %v1413_v29 }
 0x3cd   : > { %v1312_v52 = vmul.f32 %v1299_v39, %v1295_v51  ;;  %v1315_v53 = vmul.f32 %v1311_v43, %v1292_v49  ;;  %v1422_v43 = vrot.slane %v3095_v50, %v1413_v29  ;;  %v1450_v49 = vsub.s32 6, %v3082_v12 }
 0x3cf   : > { %v1362_v58 = vpop.permute.xlu0 %1361  ;;  %v1323_v59 = vpop.permute.xlu1 %1322  ;;  %v1463_v3 = vrot.slane %v3108_v56, %v1450_v49 }
 0x3d0   : > { %v1330_v60 = vsel %vm1328_vm14, %v1323_v59, %v1325_v47  ;;  %v1331_v61 = vsel %vm1328_vm14, %v1321_v34, %v1323_v59 }
 0x3d1   : > { %v1350_v63 = vmul.f32 %v1340_v54, %v1331_v61  ;;  %v1351_v0 = vmul.f32 %v1344_v57, %v1330_v60  ;;  %v1451_v57 = vrot.slane %v3103_v55, %v1450_v49 }
 0x3d3   : > { %v1366_v1 = vpop.permute.xlu0 %1365  ;;  %v1327_v4 = vpop.permute.xlu1 %1326  ;;  %v2525_v6 = vpack.c.bf16 %v1350_v63, %v1313_v41  ;;  %v2543_v25 = vpack.c.bf16 %v1351_v0, %v1314_v42 }
 0x3d4   : > { %v1329_v2 = vsel %vm1328_vm14, %v1325_v47, %v1327_v4  ;;  %v1332_v10 = vsel %vm1328_vm14, %v1327_v4, %v1321_v34 }
 0x3d5   : > { %v1349_v14 = vmul.f32 %v1336_v62, %v1332_v10  ;;  %v1352_v15 = vmul.f32 %v1348_v5, %v1329_v2  ;;  %2526 = vmatprep.subr.bf16.mxu0 %v2525_v6  ;;  %v1459_v62 = vrot.slane %v3095_v50, %v1450_v49 }
 0x3d7   : > { %v1399_v18 = vpop.permute.xlu0 %1398  ;;  %v1364_v19 = vpop.permute.xlu1 %1363  ;;  %v2527_v20 = vpack.c.bf16 %v1349_v14, %v1312_v52  ;;  %v2541_v21 = vpack.c.bf16 %v1352_v15, %v1315_v53 }
 0x3d8   : > { %v1371_v22 = vsel %vm1369_vm15, %v1364_v19, %v1366_v1  ;;  %v1372_v23 = vsel %vm1369_vm15, %v1362_v58, %v1364_v19 }
 0x3d9   : > { %v1390_v26 = vmul.f32 %v1377_v16, %v1372_v23  ;;  %v1391_v27 = vmul.f32 %v1381_v17, %v1371_v22  ;;  %2528 = vmatpush1.bf16.msra.mxu0 %v2527_v20  ;;  %2542 = vmatprep.subr.bf16.mxu1 %v2541_v21 }
 0x3da   : > { %2544 = vmatpush1.bf16.msra.mxu1 %v2543_v25 }
 0x3db   : > { %v1403_v30 = vpop.permute.xlu0 %1402  ;;  %v1368_v31 = vpop.permute.xlu1 %1367  ;;  %v2529_v32 = vpack.c.bf16 %v1391_v27, %v3044_v45  ;;  %v2531_v33 = vpack.c.bf16 %v1390_v26, %v3042_v44 }
 0x3dc   : > { %v1370_v34 = vsel %vm1369_vm15, %v1366_v1, %v1368_v31  ;;  %v1373_v7 = vsel %vm1369_vm15, %v1368_v31, %v1362_v58  ;;  %v1455_v58 = vrot.slane %v3090_v8, %v1450_v49  ;;  %v1487_v1 = vsub.s32 7, %v3082_v12 }
 0x3dd   : > { %v1392_v35 = vmul.f32 %v1385_v24, %v1370_v34  ;;  %v1393_v36 = vmul.f32 %v1389_v28, %v1373_v7  ;;  %2530 = vmatprep.subr.bf16.mxu0 %v2529_v32 }
 0x3de   : > { %2532 = vmatpush1.bf16.msra.mxu0 %v2531_v33  ;;  %v1488_v17 = vrot.slane %v3103_v55, %v1487_v1  ;;  %v1496_v26 = vrot.slane %v3095_v50, %v1487_v1  ;;  %v1500_v55 = vrot.slane %v3108_v56, %v1487_v1  ;;  %v2715_v56 = vmov 1.0|1.0  }
 0x3df   : > { %v1436_v39 = vpop.permute.xlu0 %1435  ;;  %v1401_v45 = vpop.permute.xlu1 %1400  ;;  %v2545_v44 = vpack.c.bf16 %v1393_v36, %v3048_v11  ;;  %v2547_v40 = vpack.c.bf16 %v1392_v35, %v3046_v46 }
 0x3e0   : > { %v1408_v41 = vsel %vm1406_vm0, %v1401_v45, %v1403_v30  ;;  %v1409_v42 = vsel %vm1406_vm0, %v1399_v18, %v1401_v45 }
 0x3e1   : > { %v1427_v9 = vmul.f32 %v1414_v37, %v1409_v42  ;;  %v1428_v47 = vmul.f32 %v1418_v38, %v1408_v41  ;;  %2546 = vmatprep.subr.bf16.mxu1 %v2545_v44  ;;  %v1698_v41 = vld [vmem:[#allocation7] sm:$0xff] }
 0x3e2   : > { %2548 = vmatpush1.bf16.msra.mxu1 %v2547_v40 }
 0x3e3   : > { %v1440_v51 = vpop.permute.xlu0 %1439  ;;  %v1405_v11 = vpop.permute.xlu1 %1404 }
 0x3e4   : > { %v1407_v46 = vsel %vm1406_vm0, %v1403_v30, %v1405_v11  ;;  %v1410_v52 = vsel %vm1406_vm0, %v1405_v11, %v1399_v18  ;;  %v1492_v18 = vrot.slane %v3090_v8, %v1487_v1  ;;  %v1509_v8 = vld [vmem:[%s3322_s5] sm:$0xff] }
 0x3e5   : > { %v1429_v53 = vmul.f32 %v1422_v43, %v1407_v46  ;;  %v1430_v54 = vmul.f32 %v1426_v48, %v1410_v52  ;;  %v1842_v46 = vld [vmem:[#allocation8] sm:$0xff] }
 0x3e7   : > { %v1438_v59 = vpop.permute.xlu1 %1437  ;;  %v1473_v63 = vpop.permute.xlu0 %1472 }
 0x3e8   : > { %v1445_v60 = vsel %vm1443_vm1, %v1438_v59, %v1440_v51  ;;  %v1446_v61 = vsel %vm1443_vm1, %v1436_v39, %v1438_v59 }
 0x3e9   : > { %v1464_v0 = vmul.f32 %v1451_v57, %v1446_v61  ;;  %v1465_v5 = vmul.f32 %v1455_v58, %v1445_v60 }
 0x3eb   : > { %v1442_v4 = vpop.permute.xlu1 %1441  ;;  %v2533_v6 = vpack.c.bf16 %v1465_v5, %v1428_v47  ;;  %v2535_v2 = vpack.c.bf16 %v1464_v0, %v1427_v9  ;;  %v1477_v12 = vpop.permute.xlu0 %1476 }
 0x3ec   : > { %v1444_v10 = vsel %vm1443_vm1, %v1440_v51, %v1442_v4  ;;  %v1447_v14 = vsel %vm1443_vm1, %v1442_v4, %v1436_v39 }
 0x3ed   : > { %v1466_v15 = vmul.f32 %v1459_v62, %v1444_v10  ;;  %v1467_v16 = vmul.f32 %v1463_v3, %v1447_v14  ;;  %2534 = vmatprep.subr.bf16.mxu0 %v2533_v6 }
 0x3ee   : > { %2536 = vmatpush1.bf16.msra.mxu0 %v2535_v2 }
 0x3ef   : > { %v1475_v19 = vpop.permute.xlu1 %1474  ;;  %v2549_v20 = vpack.c.bf16 %v1467_v16, %v1430_v54  ;;  %v2551_v21 = vpack.c.bf16 %v1466_v15, %v1429_v53 }
 0x3f0   : > { %v1482_v22 = vsel %vm1480_vm2, %v1475_v19, %v1477_v12  ;;  %v1483_v23 = vsel %vm1480_vm2, %v1473_v63, %v1475_v19 }
 0x3f1   : > { %v1501_v24 = vmul.f32 %v1488_v17, %v1483_v23  ;;  %v1502_v25 = vmul.f32 %v1492_v18, %v1482_v22  ;;  %2550 = vmatprep.subr.bf16.mxu1 %v2549_v20 }
 0x3f2   : > { %2552 = vmatpush1.bf16.msra.mxu1 %v2551_v21 }
 0x3f3   : > { %v1479_v27 = vpop.permute.xlu1 %1478  ;;  %1566 = vmatprep.subr.mxu0 %v1502_v25 }
 0x3f4   : > { %v1481_v28 = vsel %vm1480_vm2, %v1477_v12, %v1479_v27  ;;  %v1484_v29 = vsel %vm1480_vm2, %v1479_v27, %v1473_v63  ;;  %1567 = vmatpush1.msra.mxu0 %v1501_v24 }
 0x3f5   : > { %v1503_v30 = vmul.f32 %v1496_v26, %v1481_v28  ;;  %v1504_v50 = vmul.f32 %v1500_v55, %v1484_v29  ;;  %2135 = vmatmul.mubr.msk.f32.vlgmr.msra.gmra.mrb[0].mxu0 %vm1546_vm3, %v1509_v8  ;;  %2553 = vmatprep.subr.bf16.mxu0 %v2715_v56 }
 0x3f6   : > { %2554 = vmatpush3.bf16.msra.mxu0 %v2715_v56 }
 0x3f7   : > { %1637 = vmatprep.subr.mxu1 %v1504_v50  ;;  %2555 = vmatprep.subr.bf16.mxu0 %v2715_v56 }
 0x3f8   : > { %1638 = vmatpush1.msra.mxu1 %v1503_v30 }
 0x3f9   : > { %2136 = vmatmul.mubr.msk.f32.vlgmr.msra.gmra.mrb[0].mxu1 %vm1546_vm3, %v1509_v8  ;;  %2569 = vmatprep.subr.bf16.mxu1 %v2715_v56 }
 0x3fa   : > { %2556 = vmatpush3.bf16.msra.mxu0 %v2715_v56  ;;  %2570 = vmatpush3.bf16.msra.mxu1 %v2715_v56 }
 0x3fb   : > { %2557 = vmatprep.subr.bf16.mxu0 %v2715_v56  ;;  %2571 = vmatprep.subr.bf16.mxu1 %v2715_v56 }
 0x3fe   : > { %2558 = vmatpush3.bf16.msra.mxu0 %v2715_v56  ;;  %2572 = vmatpush3.bf16.msra.mxu1 %v2715_v56 }
 0x3ff   : > { %2559 = vmatprep.subr.bf16.mxu0 %v2715_v56  ;;  %2573 = vmatprep.subr.bf16.mxu1 %v2715_v56 }
 0x402   : > { %2560 = vmatpush3.bf16.msra.mxu0 %v2715_v56  ;;  %2574 = vmatpush3.bf16.msra.mxu1 %v2715_v56 }
 0x403   : > { %2561 = vmatprep.subr.bf16.mxu0 %v2715_v56  ;;  %2575 = vmatprep.subr.bf16.mxu1 %v2715_v56 }
 0x406   : > { %2562 = vmatpush3.bf16.msra.mxu0 %v2715_v56  ;;  %2576 = vmatpush3.bf16.msra.mxu1 %v2715_v56 }
 0x407   : > { %2563 = vmatprep.subr.bf16.mxu0 %v2715_v56  ;;  %2577 = vmatprep.subr.bf16.mxu1 %v2715_v56 }
 0x40a   : > { %2564 = vmatpush3.bf16.msra.mxu0 %v2715_v56  ;;  %2578 = vmatpush3.bf16.msra.mxu1 %v2715_v56 }
 0x40b   : > { %2565 = vmatprep.subr.bf16.mxu0 %v2715_v56  ;;  %2579 = vmatprep.subr.bf16.mxu1 %v2715_v56 }
 0x40e   : > { %2566 = vmatpush3.bf16.msra.mxu0 %v2715_v56  ;;  %2580 = vmatpush3.bf16.msra.mxu1 %v2715_v56 }
 0x40f   : > { %2567 = vmatprep.subr.bf16.mxu0 %v2715_v56  ;;  %2581 = vmatprep.subr.bf16.mxu1 %v2715_v56 }
 0x412   : > { %2568 = vmatpush3.bf16.msra.mxu0 %v2715_v56  ;;  %2582 = vmatpush3.bf16.msra.mxu1 %v2715_v56 }
 0x413   : > { %2583 = vmatprep.subr.bf16.mxu1 %v2715_v56  ;;  %2585 = vmatprep.subr.bf16.mxu0 %v2715_v56 }
 0x416   : > { %2584 = vmatpush3.bf16.msra.mxu1 %v2715_v56 }
 0x417   : > { %2601 = vmatprep.subr.bf16.mxu1 %v2715_v56 }
 0x4c8   : > { %v1616_v13 = vpop.f32.mrb[0].mxu0 }
 0x4c9   : > { %1694 = vst [vmem:[#allocation3] sm:$0xff] %v1616_v13  ;;  %v1618_v31 = vpop.f32.mrb[1].mxu0  ;;  %v1843_v35 = vmul.f32 %v1616_v13, %v1616_v13 }
 0x4ca   : > { %1695 = vst [vmem:[#allocation3 + $0x8] sm:$0xff] %v1618_v31  ;;  %v1844_v32 = vmul.f32 %v1618_v31, %v1618_v31  ;;  %1763 = vmatprep.mubr.f32.mxu0 %v1618_v31 }
 0x4cb   : > { %1764 = vmatmul.mubr.f32.vlgmr.msra.gmra.mrb[2].mxu0 %v1616_v13 }
 0x4cc   : > { %2586 = vmatpush3.bf16.msra.mxu0 %v2715_v56  ;;  %v1687_v33 = vpop.f32.mrb[0].mxu1  ;;  %1911 = vmatprep.mubr.f32.mxu0 %v1844_v32 }
 0x4cd   : > { %1696 = vst [vmem:[#allocation3 + $0x10] sm:$0xff] %v1687_v33  ;;  %v1689_v34 = vpop.f32.mrb[1].mxu1  ;;  %2587 = vmatprep.subr.bf16.mxu0 %v2715_v56  ;;  %v1845_v36 = vmul.f32 %v1687_v33, %v1687_v33 }
 0x4ce   : > { %1697 = vst [vmem:[#allocation3 + $0x18] sm:$0xff] %v1689_v34  ;;  %v1846_v7 = vmul.f32 %v1689_v34, %v1689_v34  ;;  %1833 = vmatprep.mubr.f32.mxu1 %v1689_v34 }
 0x4cf   : > { %1834 = vmatmul.mubr.f32.vlgmr.msra.gmra.mrb[2].mxu1 %v1687_v33 }
 0x4d0   : > { %2588 = vmatpush3.bf16.msra.mxu0 %v2715_v56  ;;  %2602 = vmatpush3.bf16.msra.mxu1 %v2715_v56 }
 0x4d1   : > { %1981 = vmatprep.mubr.f32.mxu1 %v1846_v7  ;;  %2589 = vmatprep.subr.bf16.mxu0 %v2715_v56 }
 0x4d2   : > { %2603 = vmatprep.subr.bf16.mxu1 %v2715_v56 }
 0x4d4   : > { %2590 = vmatpush3.bf16.msra.mxu0 %v2715_v56  ;;  %2604 = vmatpush3.bf16.msra.mxu1 %v2715_v56 }
 0x4d5   : > { %2591 = vmatprep.subr.bf16.mxu0 %v2715_v56  ;;  %2605 = vmatprep.subr.bf16.mxu1 %v2715_v56 }
 0x4d8   : > { %2592 = vmatpush3.bf16.msra.mxu0 %v2715_v56  ;;  %2606 = vmatpush3.bf16.msra.mxu1 %v2715_v56 }
 0x4d9   : > { %2593 = vmatprep.subr.bf16.mxu0 %v2715_v56  ;;  %2607 = vmatprep.subr.bf16.mxu1 %v2715_v56 }
 0x4dc   : > { %2594 = vmatpush3.bf16.msra.mxu0 %v2715_v56  ;;  %2608 = vmatpush3.bf16.msra.mxu1 %v2715_v56 }
 0x4dd   : > { %2595 = vmatprep.subr.bf16.mxu0 %v2715_v56  ;;  %2609 = vmatprep.subr.bf16.mxu1 %v2715_v56 }
 0x4e0   : > { %2596 = vmatpush3.bf16.msra.mxu0 %v2715_v56  ;;  %2610 = vmatpush3.bf16.msra.mxu1 %v2715_v56 }
 0x4e1   : > { %2597 = vmatprep.subr.bf16.mxu0 %v2715_v56  ;;  %2611 = vmatprep.subr.bf16.mxu1 %v2715_v56 }
 0x4e4   : > { %2598 = vmatpush3.bf16.msra.mxu0 %v2715_v56  ;;  %2612 = vmatpush3.bf16.msra.mxu1 %v2715_v56 }
 0x4e5   : > { %2599 = vmatprep.subr.bf16.mxu0 %v2715_v56  ;;  %2613 = vmatprep.subr.bf16.mxu1 %v2715_v56 }
 0x4e8   : > { %2600 = vmatpush3.bf16.msra.mxu0 %v2715_v56  ;;  %2614 = vmatpush3.bf16.msra.mxu1 %v2715_v56 }
 0x4e9   : > { %2615 = vmatprep.subr.bf16.mxu1 %v2715_v56 }
 0x4eb   : > { %1912 = vmatmul.mubr.f32.vlgmr.msra.gmra.mrb[4].mxu0 %v1843_v35 }
 0x4ec   : > { %2616 = vmatpush3.bf16.msra.mxu1 %v2715_v56 }
 0x4ef   : > { %1982 = vmatmul.mubr.f32.vlgmr.msra.gmra.mrb[4].mxu1 %v1845_v36 }
 0x59e   : > { %v2317_v37 = vpop.f32.mrb[2].mxu0 }
 0x59f   : > { %v2318_v38 = vpop.f32.mrb[3].mxu0 }
 0x5a0   : > { %v2319_v39 = vadd.f32 %v2318_v38, %v2317_v37 }
 0x5a2   : > { %v2352_v45 = vpop.f32.mrb[2].mxu1 }
 0x5a3   : > { %v2353_v44 = vpop.f32.mrb[3].mxu1 }
 0x5a4   : > { %v2354_v40 = vadd.f32 %v2353_v44, %v2352_v45 }
 0x5a6   : > { %v1836_v42 = vadd.f32 %v2354_v40, %v2319_v39 }
 0x5a8   : > { %v1839_v43 = vadd.f32 %v1836_v42, %v1698_v41 }
 0x5aa   : > { %1841 = vst.msk [vmem:[#allocation7] sm:$0xff] %vm1840_vm4, %v1839_v43 }
 0x5be   : > { %v2387_v9 = vpop.f32.mrb[4].mxu0 }
 0x5bf   : > { %v2388_v47 = vpop.f32.mrb[5].mxu0 }
 0x5c0   : > { %v2389_v48 = vadd.f32 %v2388_v47, %v2387_v9 }
 0x5c2   : > { %v2422_v49 = vpop.f32.mrb[4].mxu1 }
 0x5c3   : > { %v2423_v51 = vpop.f32.mrb[5].mxu1 }
 0x5c4   : > { %v2424_v11 = vadd.f32 %v2423_v51, %v2422_v49 }
 0x5c6   : > { %v1984_v52 = vadd.f32 %v2424_v11, %v2389_v48 }
 0x5c8   : > { %v1987_v53 = vadd.f32 %v1984_v52, %v1842_v46 }
 0x5ca   : > { %1988 = vst.msk [vmem:[#allocation8] sm:$0xff] %vm1840_vm4, %v1987_v53 }
 0x5cb PF: > { %p2137_p7 = scmp.ne.s32.totalorder %s2684_s27, 2 }
 0x5cc   : > { %v1993_v54 = vld [vmem:[#allocation7] sm:$0xff] (!%p2137_p7)  ;;  %v2716_v58 = vmov (!%p2137_p7), 0   ;;  %v2000_v5 = vld [vmem:[%s3323_s6] sm:$0xff] (!%p2137_p7)  ;;  %v2011_v15 = vld [vmem:[#allocation3 + $0x8] sm:$0xff] (!%p2137_p7) }
 0x5cd   : > { %1992 = sbr.rel (%p2137_p7) target bundleno = 1649 (0x671), region = 68  ;;  %2667 = vset.pattern.permute.xlu0 (!%p2137_p7), %v2716_v58  ;;  %v1994_v59 = vmul.f32 (!%p2137_p7), 0.001953125, %v1993_v54  ;;  %v2004_v4 = vld [vmem:[%s3324_s7] sm:$0xff] (!%p2137_p7)  ;;  %v2012_v16 = vld [vmem:[#allocation3 + $0x10] sm:$0xff] (!%p2137_p7)  ;;  %v2013_v17 = vld [vmem:[#allocation3 + $0x18] sm:$0xff] (!%p2137_p7) }
 0x5ce   : > { %v2010_v10 = vld [vmem:[#allocation3] sm:$0xff] (!%p2137_p7) }
 0x5cf   : > { %v1997_v61 = vmul.f32 (!%p2137_p7), %v1994_v59, %v1994_v59 }
 0x5d1   : > { %v1995_v57 = vld [vmem:[#allocation8] sm:$0xff] (!%p2137_p7) }
 0x5d2   : > { %v1996_v60 = vmul.f32 (!%p2137_p7), 0.001953125, %v1995_v57 }
 0x5d4   : > { %v1998_v62 = vsub.f32 %v1996_v60, %v1997_v61 }
 0x5d6   : > { %v1999_v63 = vmax.f32 %v1998_v62, 0.0 }
 0x5d8   : > { %v2001_v0 = vadd.f32 1e-05, %v1999_v63 }
 0x5da   : > { %2668 = vrsqrt.f32 %v2001_v0 }
 0x5e4   : > { %v2669_v3 = vpop.eup %2668 }
 0x5e5   : > { %v2003_v1 = vmul.f32 %v2669_v3, %v2000_v5 }
 0x5e7   : > { %2016 = vperm.xlu0 %2667, %v2003_v1   ;;  %v2005_v6 = vmul.f32 %v2003_v1, %v1994_v59 }
 0x5e9   : > { %v2006_v2 = vsub.f32 %v2004_v4, %v2005_v6 }
 0x5eb   : > { %2025 = vperm.xlu0 %2667, %v2006_v2  }
 0x666   : > { %v2017_v14 = vpop.permute.xlu0 %2016 }
 0x667   : > { %v2019_v18 = vmul.f32 %v2017_v14, %v2010_v10  ;;  %v2020_v12 = vmul.f32 %v2017_v14, %v2011_v15  ;;  %v2021_v19 = vmul.f32 %v2017_v14, %v2012_v16  ;;  %v2022_v20 = vmul.f32 %v2017_v14, %v2013_v17 }
 0x66a   : > { %v2026_v21 = vpop.permute.xlu0 %2025 }
 0x66b   : > { %v2028_v22 = vadd.f32 %v2026_v21, %v2019_v18  ;;  %v2029_v23 = vadd.f32 %v2026_v21, %v2020_v12  ;;  %v2030_v24 = vadd.f32 %v2026_v21, %v2021_v19  ;;  %v2031_v25 = vadd.f32 %v2026_v21, %v2022_v20 }
 0x66d   : > { %v2032_v26 = vmax.f32 %v2028_v22, 0.0  ;;  %v2033_v55 = vmax.f32 %v2029_v23, 0.0  ;;  %v2034_v8 = vmax.f32 %v2030_v24, 0.0  ;;  %v2035_v27 = vmax.f32 %v2031_v25, 0.0 }
 0x66f   : > { %2036 = vst [vmem:[%s3325_s8] sm:$0xff] %v2032_v26  ;;  %2037 = vst [vmem:[%s3325_s8 + $0x8] sm:$0xff] %v2033_v55 }
 0x670   : > { %2138 = vst [vmem:[%s3325_s8 + $0x10] sm:$0xff] %v2034_v8  ;;  %2139 = vst [vmem:[%s3325_s8 + $0x18] sm:$0xff] %v2035_v27 }
 0x671 PF: > { %s18_s29 = sadd.s32 1, %s2692_s29   ;;  %s3326_s27 = smov %s2688_s28 }
 0x672   : > { %p15_p8 = scmp.ge.s32.totalorder %s18_s29, 5   ;;  %s3327_s28 = smov %s3329_s30 }
 0x674   :  { %17 = sbr.rel (!%p15_p8) target bundleno = 2 (0x2), region = 104 }

</bundles_post_ra>
